<compile_context>
chip_gen: v7x
topology: tpu7x:2x2x1
jax: 0.10.0
libtpu: 0.0.40
codegen_flags: <defaults>
</compile_context>

<pallas_src>
import jax
import jax.numpy as jnp
from jax.experimental import pallas as pl
from jax.experimental.pallas import tpu as pltpu

CONFIG = {
    "in_features": 500,
    "layers": [512, 256, 128, 2],
    "minibatch_size": 256,
    "use_batchnorm": True,
    "use_tanh": False,
}

_BN_EPS = 1e-5
_NEG_SLOPE = 0.2
_OUT_PAD = 128   # final layer output padded 2 -> 128 (lane-dense store)


def _encoder_kernel(x_ref, w1_ref, w2_ref, w3_ref, w4_ref, vec_ref, out_ref):
    inv_b = 1.0 / x_ref.shape[0]  # rows per grid step (static)

    def bn_lrelu(h, gamma, beta):
        # Single-pass batch stats: var = E[h^2] - mean^2 (biased, BN training mode).
        mean = jnp.sum(h, axis=0, keepdims=True) * inv_b
        mean_sq = jnp.sum(h * h, axis=0, keepdims=True) * inv_b
        var = jnp.maximum(mean_sq - mean * mean, 0.0)  # clamp fp cancellation
        # Fused affine: hn = h*scale + shift  (2 per-element VPU passes).
        scale = gamma * jax.lax.rsqrt(var + _BN_EPS)   # rsqrt -> EUP (free slot)
        shift = beta - mean * scale
        hn = h * scale + shift
        # LeakyReLU(0.2)
        return jnp.where(hn >= 0, hn, _NEG_SLOPE * hn)

    # bf16 only at the MXU operands; all elementwise math stays f32 (v5e-safe).
    x = x_ref[...].astype(jnp.bfloat16)

    # b1..b3 intentionally omitted: a bias immediately followed by training-mode
    # BatchNorm is exactly cancelled by the mean subtraction.
    # K = 500 contraction: Mosaic masks the tail, no wrapper-side pad needed.
    h = jnp.dot(x, w1_ref[...], preferred_element_type=jnp.float32)
    h = bn_lrelu(h, vec_ref[0:1, :512], vec_ref[1:2, :512])

    h = jnp.dot(h.astype(jnp.bfloat16), w2_ref[...], preferred_element_type=jnp.float32)
    h = bn_lrelu(h, vec_ref[2:3, :256], vec_ref[3:4, :256])

    h = jnp.dot(h.astype(jnp.bfloat16), w3_ref[...], preferred_element_type=jnp.float32)
    h = bn_lrelu(h, vec_ref[4:5, :128], vec_ref[5:6, :128])

    embed = jnp.dot(h.astype(jnp.bfloat16), w4_ref[...],
                    preferred_element_type=jnp.float32) + vec_ref[6:7, :_OUT_PAD]
    # use_tanh is False in CONFIG -> no tanh.
    out_ref[...] = embed.astype(out_ref.dtype)


def encoder_forward(x, packed, mb_rows=None):
    """x: [B, 500] f32.  packed: (w1,w2,w3,w4,vec) from pack_params().

    mb_rows=None  -> single block, BN statistics over the full batch
                     (exact semantics of Encoder.forward(x)).
    mb_rows=M     -> grid over B//M minibatches; each grid step computes BN over
                     its own M-row minibatch (standard per-minibatch training
                     semantics).  Weights stay VMEM-resident across steps and the
                     grid axis is megacore-parallel on v7x.
    """
    w1, w2, w3, w4, vec = packed
    B, F = x.shape
    assert F == CONFIG["in_features"]
    if mb_rows is None or mb_rows >= B:
        mb_rows = B
    else:
        assert B % mb_rows == 0, "batch must be a whole number of minibatches"
        assert mb_rows % 8 == 0, "minibatch rows must be sublane-aligned"
    num_mb = B // mb_rows

    flops = 2 * B * (F * 512 + 512 * 256 + 256 * 128 + 128 * _OUT_PAD)
    bytes_accessed = (
        x.size * 4
        + (w1.size + w2.size + w3.size + w4.size) * 2  # bf16 weights, fetched once
        + vec.size * 4
        + B * _OUT_PAD * 4
    )

    out_padded = pl.pallas_call(
        _encoder_kernel,
        out_shape=jax.ShapeDtypeStruct((B, _OUT_PAD), jnp.float32),
        grid=(num_mb,),
        in_specs=[
            pl.BlockSpec((mb_rows, F), lambda i: (i, 0)),   # x: streamed per minibatch
            pl.BlockSpec(w1.shape, lambda i: (0, 0)),       # weights/vec: constant index
            pl.BlockSpec(w2.shape, lambda i: (0, 0)),       #  -> DMA'd once, VMEM-resident
            pl.BlockSpec(w3.shape, lambda i: (0, 0)),
            pl.BlockSpec(w4.shape, lambda i: (0, 0)),
            pl.BlockSpec(vec.shape, lambda i: (0, 0)),
        ],
        out_specs=pl.BlockSpec((mb_rows, _OUT_PAD), lambda i: (i, 0)),
        compiler_params=pltpu.CompilerParams(
            dimension_semantics=("parallel",)),             # megacore sharding on v7x
        cost_estimate=pl.CostEstimate(
            flops=flops, transcendentals=512 + 256 + 128,
            bytes_accessed=bytes_accessed),
    )(x, w1, w2, w3, w4, vec)

    # TODO(synk): fuse this [:, :2] slice into the downstream consumer if possible.
    return out_padded[:, : CONFIG["layers"][-1]]


def init_params(key):
    """PyTorch-style f32 params (nn.Linear default init U[-1/sqrt(fan_in), +])."""
    dims = [CONFIG["in_features"]] + CONFIG["layers"]
    keys = jax.random.split(key, 8)
    p = {}
    ki = 0
    for li in range(4):
        fan_in, fan_out = dims[li], dims[li + 1]
        bound = 1.0 / (fan_in ** 0.5)
        p[f"w{li+1}"] = jax.random.uniform(keys[ki], (fan_in, fan_out),
                                           jnp.float32, -bound, bound); ki += 1
        p[f"b{li+1}"] = jax.random.uniform(keys[ki], (1, fan_out),
                                           jnp.float32, -bound, bound); ki += 1
        if li < 3:
            p[f"g{li+1}"] = jnp.ones((1, fan_out), jnp.float32)
            p[f"be{li+1}"] = jnp.zeros((1, fan_out), jnp.float32)
    return p


def pack_params(p):
    """Kernel-ready params: bf16 weights + one dense [8,512] f32 vector slab."""
    w1 = p["w1"].astype(jnp.bfloat16)                       # [500, 512] (no K pad)
    w2 = p["w2"].astype(jnp.bfloat16)                       # [512, 256]
    w3 = p["w3"].astype(jnp.bfloat16)                       # [256, 128]
    w4 = jnp.zeros((128, _OUT_PAD), jnp.float32).at[:, :2].set(p["w4"])
    w4 = w4.astype(jnp.bfloat16)                            # [128, 128] (N pad)

    vec = jnp.zeros((8, 512), jnp.float32)
    vec = vec.at[0, :512].set(p["g1"][0])
    vec = vec.at[1, :512].set(p["be1"][0])
    vec = vec.at[2, :256].set(p["g2"][0])
    vec = vec.at[3, :256].set(p["be2"][0])
    vec = vec.at[4, :128].set(p["g3"][0])
    vec = vec.at[5, :128].set(p["be3"][0])
    vec = vec.at[6, :2].set(p["b4"][0])
    # b1..b3 intentionally NOT packed (mathematically cancelled by BatchNorm).
    return (w1, w2, w3, w4, vec)


def _dot_hi(a, b):
    return jnp.dot(a, b, precision=jax.lax.Precision.HIGHEST)


def encoder_reference(x, p):
    """Full-f32 PyTorch-semantic forward (biases included), for semantic check."""
    def bn_lrelu(h, gamma, beta):
        mean = jnp.mean(h, axis=0, keepdims=True)
        var = jnp.mean((h - mean) ** 2, axis=0, keepdims=True)
        hn = (h - mean) / jnp.sqrt(var + _BN_EPS) * gamma + beta
        return jnp.where(hn >= 0, hn, _NEG_SLOPE * hn)

    h = bn_lrelu(_dot_hi(x, p["w1"]) + p["b1"], p["g1"], p["be1"])
    h = bn_lrelu(_dot_hi(h, p["w2"]) + p["b2"], p["g2"], p["be2"])
    h = bn_lrelu(_dot_hi(h, p["w3"]) + p["b3"], p["g3"], p["be3"])
    return _dot_hi(h, p["w4"]) + p["b4"]


def encoder_reference_packed(x, packed):
    """Pure-JAX reference of the exact kernel math (bf16 matmul operands)."""
    w1, w2, w3, w4, vec = packed

    def bn_lrelu(h, gamma, beta):
        mean = jnp.mean(h, axis=0, keepdims=True)
        var = jnp.maximum(jnp.mean(h * h, axis=0, keepdims=True) - mean * mean, 0.0)
        scale = gamma * jax.lax.rsqrt(var + _BN_EPS)
        shift = beta - mean * scale
        hn = h * scale + shift
        return jnp.where(hn >= 0, hn, _NEG_SLOPE * hn)

    h = jnp.dot(x.astype(jnp.bfloat16), w1, preferred_element_type=jnp.float32)
    h = bn_lrelu(h, vec[0:1, :512], vec[1:2, :512])
    h = jnp.dot(h.astype(jnp.bfloat16), w2, preferred_element_type=jnp.float32)
    h = bn_lrelu(h, vec[2:3, :256], vec[3:4, :256])
    h = jnp.dot(h.astype(jnp.bfloat16), w3, preferred_element_type=jnp.float32)
    h = bn_lrelu(h, vec[4:5, :128], vec[5:6, :128])
    out = jnp.dot(h.astype(jnp.bfloat16), w4,
                  preferred_element_type=jnp.float32) + vec[6:7, :_OUT_PAD]
    return out[:, : CONFIG["layers"][-1]]


if __name__ == "__main__":
    key = jax.random.PRNGKey(0)
    k_x, k_p = jax.random.split(key)

    params = init_params(k_p)
    packed = pack_params(params)

    # --- Case 1: single block (grid=(1,)) -> exact full-batch BN semantics ---
    B1 = 64
    x1 = jax.random.normal(k_x, (B1, CONFIG["in_features"]), jnp.float32)
    out1 = jax.block_until_ready(encoder_forward(x1, packed))
    assert out1.shape == (B1, CONFIG["layers"][-1])

    # Tight check: kernel vs pure-JAX with identical (bf16-weight) math.
    ref1_packed = encoder_reference_packed(x1, packed)
    assert jnp.allclose(out1, ref1_packed, atol=2e-3, rtol=2e-3), \
        "mismatch vs packed reference"

    # Semantic check vs full-f32 PyTorch-style forward (bf16 weights drift slightly).
    ref1_f32 = encoder_reference(x1, params)
    assert jnp.allclose(out1, ref1_f32, atol=1.5e-1, rtol=1e-1), \
        "mismatch vs f32 reference"

    # --- Case 2: minibatch grid (weights VMEM-resident, megacore-parallel) ---
    B2, MB = 128, 64
    x2 = jax.random.normal(jax.random.PRNGKey(1), (B2, CONFIG["in_features"]),
                           jnp.float32)
    out2 = jax.block_until_ready(encoder_forward(x2, packed, mb_rows=MB))
    assert out2.shape == (B2, CONFIG["layers"][-1])
    ref2 = jnp.concatenate(
        [encoder_reference_packed(x2[i * MB:(i + 1) * MB], packed)
         for i in range(B2 // MB)], axis=0)
    assert jnp.allclose(out2, ref2, atol=2e-3, rtol=2e-3), \
        "mismatch vs per-minibatch packed reference"

    print("KERNEL_OK")
</pallas_src>

<mosaic_0001>
module attributes {stable_mosaic.version = 11 : i64} {
  func.func @_encoder_kernel(%arg0: i32, %arg1: memref<64x500xf32, #tpu.memory_space<vmem>>, %arg2: memref<500x512xbf16, #tpu.memory_space<vmem>>, %arg3: memref<512x256xbf16, #tpu.memory_space<vmem>>, %arg4: memref<256x128xbf16, #tpu.memory_space<vmem>>, %arg5: memref<128x128xbf16, #tpu.memory_space<vmem>>, %arg6: memref<8x512xf32, #tpu.memory_space<vmem>>, %arg7: memref<64x128xf32, #tpu.memory_space<vmem>>) attributes {dimension_semantics = [#tpu.dimension_semantics<parallel>], iteration_bounds = array<i64: 1>, scalar_prefetch = 0 : i64, scratch_operands = 0 : i64, tpu.core_type = #tpu.core_type<tc>, window_params = [{transform_indices = @transform_0, window_bounds = array<i64: 64, 500>}, {pipeline_mode = #tpu.pipeline_mode<synchronous>, transform_indices = @transform_1, window_bounds = array<i64: 500, 512>}, {pipeline_mode = #tpu.pipeline_mode<synchronous>, transform_indices = @transform_2, window_bounds = array<i64: 512, 256>}, {pipeline_mode = #tpu.pipeline_mode<synchronous>, transform_indices = @transform_3, window_bounds = array<i64: 256, 128>}, {pipeline_mode = #tpu.pipeline_mode<synchronous>, transform_indices = @transform_4, window_bounds = array<i64: 128, 128>}, {pipeline_mode = #tpu.pipeline_mode<synchronous>, transform_indices = @transform_5, window_bounds = array<i64: 8, 512>}, {transform_indices = @transform_6, window_bounds = array<i64: 64, 128>}]} {
    %c0 = arith.constant 0 : index
    %c0_0 = arith.constant 0 : index
    %0 = vector.load %arg1[%c0, %c0_0] : memref<64x500xf32, #tpu.memory_space<vmem>>, vector<64x500xf32>
    %1 = arith.truncf %0 : vector<64x500xf32> to vector<64x500xbf16>
    %c0_1 = arith.constant 0 : index
    %c0_2 = arith.constant 0 : index
    %2 = vector.load %arg2[%c0_1, %c0_2] : memref<500x512xbf16, #tpu.memory_space<vmem>>, vector<500x512xbf16>
    %cst = arith.constant dense<0.000000e+00> : vector<64x512xf32>
    %3 = tpu.matmul %1, %2, %cst {dimension_numbers = #tpu.dot_dimension_numbers<[1], [0], [0], [1], [0, 0, 1, 1], [], []>} : vector<64x500xbf16>, vector<500x512xbf16>, vector<64x512xf32> -> vector<64x512xf32>
    %c0_3 = arith.constant 0 : index
    %c0_4 = arith.constant 0 : index
    %4 = vector.load %arg6[%c0_3, %c0_4] : memref<8x512xf32, #tpu.memory_space<vmem>>, vector<1x512xf32>
    %c1 = arith.constant 1 : index
    %c0_5 = arith.constant 0 : index
    %5 = vector.load %arg6[%c1, %c0_5] : memref<8x512xf32, #tpu.memory_space<vmem>>, vector<1x512xf32>
    %cst_6 = arith.constant dense<0.000000e+00> : vector<512xf32>
    %6 = vector.multi_reduction <add>, %3, %cst_6 [0] : vector<64x512xf32> to vector<512xf32>
    %7 = vector.shape_cast %6 : vector<512xf32> to vector<1x512xf32>
    %cst_7 = arith.constant 1.562500e-02 : f32
    %8 = vector.broadcast %cst_7 : f32 to vector<1x512xf32>
    %9 = arith.mulf %7, %8 : vector<1x512xf32>
    %10 = arith.mulf %3, %3 : vector<64x512xf32>
    %cst_8 = arith.constant dense<0.000000e+00> : vector<512xf32>
    %11 = vector.multi_reduction <add>, %10, %cst_8 [0] : vector<64x512xf32> to vector<512xf32>
    %12 = vector.shape_cast %11 : vector<512xf32> to vector<1x512xf32>
    %cst_9 = arith.constant 1.562500e-02 : f32
    %13 = vector.broadcast %cst_9 : f32 to vector<1x512xf32>
    %14 = arith.mulf %12, %13 : vector<1x512xf32>
    %15 = arith.mulf %9, %9 : vector<1x512xf32>
    %16 = arith.subf %14, %15 : vector<1x512xf32>
    %cst_10 = arith.constant 0.000000e+00 : f32
    %17 = vector.broadcast %cst_10 : f32 to vector<1x512xf32>
    %18 = arith.maximumf %16, %17 : vector<1x512xf32>
    %cst_11 = arith.constant 9.99999974E-6 : f32
    %19 = vector.broadcast %cst_11 : f32 to vector<1x512xf32>
    %20 = arith.addf %18, %19 : vector<1x512xf32>
    %21 = math.rsqrt %20 : vector<1x512xf32>
    %22 = arith.mulf %4, %21 : vector<1x512xf32>
    %23 = arith.mulf %9, %22 : vector<1x512xf32>
    %24 = arith.subf %5, %23 : vector<1x512xf32>
    %25 = vector.broadcast %22 : vector<1x512xf32> to vector<64x512xf32>
    %26 = arith.mulf %3, %25 : vector<64x512xf32>
    %27 = vector.broadcast %24 : vector<1x512xf32> to vector<64x512xf32>
    %28 = arith.addf %26, %27 : vector<64x512xf32>
    %cst_12 = arith.constant 0.000000e+00 : f32
    %29 = vector.broadcast %cst_12 : f32 to vector<64x512xf32>
    %30 = arith.cmpf oge, %28, %29 : vector<64x512xf32>
    %cst_13 = arith.constant 2.000000e-01 : f32
    %31 = vector.broadcast %cst_13 : f32 to vector<64x512xf32>
    %32 = arith.mulf %31, %28 : vector<64x512xf32>
    %33 = arith.select %30, %28, %32 : vector<64x512xi1>, vector<64x512xf32>
    %34 = arith.truncf %33 : vector<64x512xf32> to vector<64x512xbf16>
    %c0_14 = arith.constant 0 : index
    %c0_15 = arith.constant 0 : index
    %35 = vector.load %arg3[%c0_14, %c0_15] : memref<512x256xbf16, #tpu.memory_space<vmem>>, vector<512x256xbf16>
    %cst_16 = arith.constant dense<0.000000e+00> : vector<64x256xf32>
    %36 = tpu.matmul %34, %35, %cst_16 {dimension_numbers = #tpu.dot_dimension_numbers<[1], [0], [0], [1], [0, 0, 1, 1], [], []>} : vector<64x512xbf16>, vector<512x256xbf16>, vector<64x256xf32> -> vector<64x256xf32>
    %c2 = arith.constant 2 : index
    %c0_17 = arith.constant 0 : index
    %37 = vector.load %arg6[%c2, %c0_17] : memref<8x512xf32, #tpu.memory_space<vmem>>, vector<1x256xf32>
    %c3 = arith.constant 3 : index
    %c0_18 = arith.constant 0 : index
    %38 = vector.load %arg6[%c3, %c0_18] : memref<8x512xf32, #tpu.memory_space<vmem>>, vector<1x256xf32>
    %cst_19 = arith.constant dense<0.000000e+00> : vector<256xf32>
    %39 = vector.multi_reduction <add>, %36, %cst_19 [0] : vector<64x256xf32> to vector<256xf32>
    %40 = vector.shape_cast %39 : vector<256xf32> to vector<1x256xf32>
    %cst_20 = arith.constant 1.562500e-02 : f32
    %41 = vector.broadcast %cst_20 : f32 to vector<1x256xf32>
    %42 = arith.mulf %40, %41 : vector<1x256xf32>
    %43 = arith.mulf %36, %36 : vector<64x256xf32>
    %cst_21 = arith.constant dense<0.000000e+00> : vector<256xf32>
    %44 = vector.multi_reduction <add>, %43, %cst_21 [0] : vector<64x256xf32> to vector<256xf32>
    %45 = vector.shape_cast %44 : vector<256xf32> to vector<1x256xf32>
    %cst_22 = arith.constant 1.562500e-02 : f32
    %46 = vector.broadcast %cst_22 : f32 to vector<1x256xf32>
    %47 = arith.mulf %45, %46 : vector<1x256xf32>
    %48 = arith.mulf %42, %42 : vector<1x256xf32>
    %49 = arith.subf %47, %48 : vector<1x256xf32>
    %cst_23 = arith.constant 0.000000e+00 : f32
    %50 = vector.broadcast %cst_23 : f32 to vector<1x256xf32>
    %51 = arith.maximumf %49, %50 : vector<1x256xf32>
    %cst_24 = arith.constant 9.99999974E-6 : f32
    %52 = vector.broadcast %cst_24 : f32 to vector<1x256xf32>
    %53 = arith.addf %51, %52 : vector<1x256xf32>
    %54 = math.rsqrt %53 : vector<1x256xf32>
    %55 = arith.mulf %37, %54 : vector<1x256xf32>
    %56 = arith.mulf %42, %55 : vector<1x256xf32>
    %57 = arith.subf %38, %56 : vector<1x256xf32>
    %58 = vector.broadcast %55 : vector<1x256xf32> to vector<64x256xf32>
    %59 = arith.mulf %36, %58 : vector<64x256xf32>
    %60 = vector.broadcast %57 : vector<1x256xf32> to vector<64x256xf32>
    %61 = arith.addf %59, %60 : vector<64x256xf32>
    %cst_25 = arith.constant 0.000000e+00 : f32
    %62 = vector.broadcast %cst_25 : f32 to vector<64x256xf32>
    %63 = arith.cmpf oge, %61, %62 : vector<64x256xf32>
    %cst_26 = arith.constant 2.000000e-01 : f32
    %64 = vector.broadcast %cst_26 : f32 to vector<64x256xf32>
    %65 = arith.mulf %64, %61 : vector<64x256xf32>
    %66 = arith.select %63, %61, %65 : vector<64x256xi1>, vector<64x256xf32>
    %67 = arith.truncf %66 : vector<64x256xf32> to vector<64x256xbf16>
    %c0_27 = arith.constant 0 : index
    %c0_28 = arith.constant 0 : index
    %68 = vector.load %arg4[%c0_27, %c0_28] : memref<256x128xbf16, #tpu.memory_space<vmem>>, vector<256x128xbf16>
    %cst_29 = arith.constant dense<0.000000e+00> : vector<64x128xf32>
    %69 = tpu.matmul %67, %68, %cst_29 {dimension_numbers = #tpu.dot_dimension_numbers<[1], [0], [0], [1], [0, 0, 1, 1], [], []>} : vector<64x256xbf16>, vector<256x128xbf16>, vector<64x128xf32> -> vector<64x128xf32>
    %c4 = arith.constant 4 : index
    %c0_30 = arith.constant 0 : index
    %70 = vector.load %arg6[%c4, %c0_30] : memref<8x512xf32, #tpu.memory_space<vmem>>, vector<1x128xf32>
    %c5 = arith.constant 5 : index
    %c0_31 = arith.constant 0 : index
    %71 = vector.load %arg6[%c5, %c0_31] : memref<8x512xf32, #tpu.memory_space<vmem>>, vector<1x128xf32>
    %cst_32 = arith.constant dense<0.000000e+00> : vector<128xf32>
    %72 = vector.multi_reduction <add>, %69, %cst_32 [0] : vector<64x128xf32> to vector<128xf32>
    %73 = vector.shape_cast %72 : vector<128xf32> to vector<1x128xf32>
    %cst_33 = arith.constant 1.562500e-02 : f32
    %74 = vector.broadcast %cst_33 : f32 to vector<1x128xf32>
    %75 = arith.mulf %73, %74 : vector<1x128xf32>
    %76 = arith.mulf %69, %69 : vector<64x128xf32>
    %cst_34 = arith.constant dense<0.000000e+00> : vector<128xf32>
    %77 = vector.multi_reduction <add>, %76, %cst_34 [0] : vector<64x128xf32> to vector<128xf32>
    %78 = vector.shape_cast %77 : vector<128xf32> to vector<1x128xf32>
    %cst_35 = arith.constant 1.562500e-02 : f32
    %79 = vector.broadcast %cst_35 : f32 to vector<1x128xf32>
    %80 = arith.mulf %78, %79 : vector<1x128xf32>
    %81 = arith.mulf %75, %75 : vector<1x128xf32>
    %82 = arith.subf %80, %81 : vector<1x128xf32>
    %cst_36 = arith.constant 0.000000e+00 : f32
    %83 = vector.broadcast %cst_36 : f32 to vector<1x128xf32>
    %84 = arith.maximumf %82, %83 : vector<1x128xf32>
    %cst_37 = arith.constant 9.99999974E-6 : f32
    %85 = vector.broadcast %cst_37 : f32 to vector<1x128xf32>
    %86 = arith.addf %84, %85 : vector<1x128xf32>
    %87 = math.rsqrt %86 : vector<1x128xf32>
    %88 = arith.mulf %70, %87 : vector<1x128xf32>
    %89 = arith.mulf %75, %88 : vector<1x128xf32>
    %90 = arith.subf %71, %89 : vector<1x128xf32>
    %91 = vector.broadcast %88 : vector<1x128xf32> to vector<64x128xf32>
    %92 = arith.mulf %69, %91 : vector<64x128xf32>
    %93 = vector.broadcast %90 : vector<1x128xf32> to vector<64x128xf32>
    %94 = arith.addf %92, %93 : vector<64x128xf32>
    %cst_38 = arith.constant 0.000000e+00 : f32
    %95 = vector.broadcast %cst_38 : f32 to vector<64x128xf32>
    %96 = arith.cmpf oge, %94, %95 : vector<64x128xf32>
    %cst_39 = arith.constant 2.000000e-01 : f32
    %97 = vector.broadcast %cst_39 : f32 to vector<64x128xf32>
    %98 = arith.mulf %97, %94 : vector<64x128xf32>
    %99 = arith.select %96, %94, %98 : vector<64x128xi1>, vector<64x128xf32>
    %100 = arith.truncf %99 : vector<64x128xf32> to vector<64x128xbf16>
    %c0_40 = arith.constant 0 : index
    %c0_41 = arith.constant 0 : index
    %101 = vector.load %arg5[%c0_40, %c0_41] : memref<128x128xbf16, #tpu.memory_space<vmem>>, vector<128x128xbf16>
    %cst_42 = arith.constant dense<0.000000e+00> : vector<64x128xf32>
    %102 = tpu.matmul %100, %101, %cst_42 {dimension_numbers = #tpu.dot_dimension_numbers<[1], [0], [0], [1], [0, 0, 1, 1], [], []>} : vector<64x128xbf16>, vector<128x128xbf16>, vector<64x128xf32> -> vector<64x128xf32>
    %c6 = arith.constant 6 : index
    %c0_43 = arith.constant 0 : index
    %103 = vector.load %arg6[%c6, %c0_43] : memref<8x512xf32, #tpu.memory_space<vmem>>, vector<1x128xf32>
    %104 = vector.broadcast %103 : vector<1x128xf32> to vector<64x128xf32>
    %105 = arith.addf %102, %104 : vector<64x128xf32>
    %c0_44 = arith.constant 0 : index
    %c0_45 = arith.constant 0 : index
    %106 = vector.load %arg7[%c0_44, %c0_45] : memref<64x128xf32, #tpu.memory_space<vmem>>, vector<64x128xf32>
    tpu.vector_store %arg7[%c0_44, %c0_45], %105 {strides = array<i32>} : memref<64x128xf32, #tpu.memory_space<vmem>>, vector<64x128xf32>,
    return
  }
  func.func @transform_0(%arg0: i32) -> (i32, i32) {
    %c0_i32 = arith.constant 0 : i32
    %c0_i32_0 = arith.constant 0 : i32
    return %arg0, %c0_i32 : i32, i32
  }
  func.func @transform_1(%arg0: i32) -> (i32, i32) {
    %c0_i32 = arith.constant 0 : i32
    %c0_i32_0 = arith.constant 0 : i32
    %c0_i32_1 = arith.constant 0 : i32
    return %c0_i32, %c0_i32_0 : i32, i32
  }
  func.func @transform_2(%arg0: i32) -> (i32, i32) {
    %c0_i32 = arith.constant 0 : i32
    %c0_i32_0 = arith.constant 0 : i32
    %c0_i32_1 = arith.constant 0 : i32
    return %c0_i32, %c0_i32_0 : i32, i32
  }
  func.func @transform_3(%arg0: i32) -> (i32, i32) {
    %c0_i32 = arith.constant 0 : i32
    %c0_i32_0 = arith.constant 0 : i32
    %c0_i32_1 = arith.constant 0 : i32
    return %c0_i32, %c0_i32_0 : i32, i32
  }
  func.func @transform_4(%arg0: i32) -> (i32, i32) {
    %c0_i32 = arith.constant 0 : i32
    %c0_i32_0 = arith.constant 0 : i32
    %c0_i32_1 = arith.constant 0 : i32
    return %c0_i32, %c0_i32_0 : i32, i32
  }
  func.func @transform_5(%arg0: i32) -> (i32, i32) {
    %c0_i32 = arith.constant 0 : i32
    %c0_i32_0 = arith.constant 0 : i32
    %c0_i32_1 = arith.constant 0 : i32
    return %c0_i32, %c0_i32_0 : i32, i32
  }
  func.func @transform_6(%arg0: i32) -> (i32, i32) {
    %c0_i32 = arith.constant 0 : i32
    %c0_i32_0 = arith.constant 0 : i32
    return %arg0, %c0_i32 : i32, i32
  }
}

</mosaic_0001>

<bundles_post_ra>
// kernel: tpu_custom_call.1
= control target key start
LH: loop header
LB: loop body
LE: loop exit
PB: predicated region body
PF: predicated region fallthrough
CT: control target
= control target key end

     0   :  { %11 = vsyncpa [#allocation3], 0  ;;  %s4455_s0 = inlined_call_operand.hbm [shape: f32[64,500], index: 0, kind: input, shape index: {}]   ;;  %s4456_s1 = inlined_call_operand.hbm [shape: bf16[500,512], index: 1, kind: input, shape index: {}]   ;;  %s4457_s2 = inlined_call_operand.hbm [shape: bf16[512,256], index: 2, kind: input, shape index: {}]   ;;  %s4458_s3 = inlined_call_operand.hbm [shape: bf16[256,128], index: 3, kind: input, shape index: {}]   ;;  %s4459_s4 = inlined_call_operand.hbm [shape: bf16[128,128], index: 4, kind: input, shape index: {}]   ;;  %s4460_s5 = inlined_call_operand.hbm [shape: f32[8,512], index: 5, kind: input, shape index: {}]   ;;  %s4461_s6 = inlined_call_operand.hbm [shape: f32[64,128], index: 6, kind: output, shape index: {}]  }
   0x1   :  { %12 = vsyncpa [#allocation6], 0 }
   0x2   :  { %13 = vsyncpa [#allocation9], 0 }
   0x3   :  { %14 = vsyncpa [#allocation12], 0 }
   0x4   :  { %15 = vsyncpa [#allocation4], 0  ;;  %s3737_s21 = smov [#allocation5]   ;;  %s3573_s25 = scalar_lea.hbm %s4456_s1, 16128 }
   0x5   :  { %s33_s22 = sshll.u32 %s3737_s21, 4  ;;  %p3574_p0 = scmp.ne.s32.totalorder %s4456_s1, %s3573_s25  ;;  %s34_s22 = int_to_ptr.vmem [resolvable:$true] %s33_s22 }
   0x6   :  { %p3577_p1 = scmp.lt.u32.totalorder %s3573_s25, %s4456_s1 }
   0x8   :  { %p3579_p2 = pnand %p3577_p1, %p3574_p0 }
   0xa   :  { %3582 = shalt.err (!%p3579_p2)
}
   0xb   :  { %s3583_s30 = scalar_lea.vmem %s34_s22, 16128  ;;  %p3588_p4 = scmp.lt.s32.totalorder %s34_s22, %s34_s22 }
   0xc   :  { %p3584_p3 = scmp.ne.s32.totalorder %s34_s22, %s3583_s30  ;;  %p3589_p5 = scmp.lt.s32.totalorder %s3583_s30, %s3583_s30 }
   0xe   :  { %p3590_p6 = por %p3589_p5, %p3588_p4 }
  0x10   :  { %p3591_p7 = pnand %p3590_p6, %p3584_p3 }
  0x12   :  { %3594 = shalt.err (!%p3591_p7)
}
  0x13   :  { %s3738_s7 = smov 256   ;;  %s3739_s8 = smov 16  }
  0x14   :  { %39 = dma.hbm_to_vmem [thread:$0]  %s4456_s1, 16128, %s34_s22, [#allocation6], %s3738_s7, %s3738_s7, %s3739_s8  }
  0x15   :  { %s3740_s11 = smov [#allocation8]   ;;  %s3595_s15 = scalar_lea.hbm %s4458_s3, 2048 }
  0x16   :  { %s57_s12 = sshll.u32 %s3740_s11, 4  ;;  %p3596_p8 = scmp.ne.s32.totalorder %s4458_s3, %s3595_s15  ;;  %s58_s12 = int_to_ptr.vmem [resolvable:$true] %s57_s12 }
  0x17   :  { %p3599_p9 = scmp.lt.u32.totalorder %s3595_s15, %s4458_s3 }
  0x19   :  { %p3601_p10 = pnand %p3599_p9, %p3596_p8 }
  0x1b   :  { %3604 = shalt.err (!%p3601_p10)
}
  0x1c   :  { %s3605_s20 = scalar_lea.vmem %s58_s12, 2048  ;;  %p3610_p12 = scmp.lt.s32.totalorder %s58_s12, %s58_s12 }
  0x1d   :  { %p3606_p11 = scmp.ne.s32.totalorder %s58_s12, %s3605_s20  ;;  %p3611_p13 = scmp.lt.s32.totalorder %s3605_s20, %s3605_s20 }
  0x1f   :  { %p3612_p0 = por %p3611_p13, %p3610_p12 }
  0x21   :  { %p3613_p1 = pnand %p3612_p0, %p3606_p11 }
  0x23   :  { %3616 = shalt.err (!%p3613_p1)
}
  0x24   :  { %s3741_s1 = smov 64   ;;  %s3742_s21 = smov 4  }
  0x25   :  { %63 = dma.hbm_to_vmem [thread:$0]  %s4458_s3, 2048, %s58_s12, [#allocation9], %s3741_s1, %s3741_s1, %s3742_s21  }
  0x26   :  { %s3743_s24 = smov [#allocation2]   ;;  %s3617_s28 = scalar_lea.hbm %s4455_s0, 4096 }
  0x27   :  { %s21_s25 = sshll.u32 %s3743_s24, 4  ;;  %p3618_p2 = scmp.ne.s32.totalorder %s4455_s0, %s3617_s28  ;;  %s22_s25 = int_to_ptr.vmem [resolvable:$true] %s21_s25 }
  0x28   :  { %p3621_p3 = scmp.lt.u32.totalorder %s3617_s28, %s4455_s0 }
  0x2a   :  { %p3623_p4 = pnand %p3621_p3, %p3618_p2 }
  0x2c   :  { %3626 = shalt.err (!%p3623_p4)
}
  0x2d   :  { %s3627_s9 = scalar_lea.vmem %s22_s25, 4096  ;;  %p3632_p6 = scmp.lt.s32.totalorder %s22_s25, %s22_s25 }
  0x2e   :  { %p3628_p5 = scmp.ne.s32.totalorder %s22_s25, %s3627_s9  ;;  %p3633_p7 = scmp.lt.s32.totalorder %s3627_s9, %s3627_s9 }
  0x30   :  { %p3634_p8 = por %p3633_p7, %p3632_p6 }
  0x32   :  { %p3635_p9 = pnand %p3634_p8, %p3628_p5 }
  0x34   :  { %3638 = shalt.err (!%p3635_p9)
}
  0x35   :  { %s3744_s3 = smov 512   ;;  %s3745_s10 = smov 32  }
  0x36   :  { %27 = dma.hbm_to_vmem [thread:$0]  %s4455_s0, 4096, %s22_s25, [#allocation3], %s3744_s3, %s3744_s3, %s3745_s10  }
  0x37   :  { %s3746_s13 = smov [#allocation7]   ;;  %s3639_s17 = scalar_lea.hbm %s4457_s2, 8192 }
  0x38   :  { %s45_s14 = sshll.u32 %s3746_s13, 4  ;;  %p3640_p10 = scmp.ne.s32.totalorder %s4457_s2, %s3639_s17  ;;  %s46_s14 = int_to_ptr.vmem [resolvable:$true] %s45_s14 }
  0x39   :  { %p3643_p11 = scmp.lt.u32.totalorder %s3639_s17, %s4457_s2 }
  0x3b   :  { %p3645_p12 = pnand %p3643_p11, %p3640_p10 }
  0x3d   :  { %3648 = shalt.err (!%p3645_p12)
}
  0x3e   :  { %s3649_s23 = scalar_lea.vmem %s46_s14, 8192  ;;  %p3654_p0 = scmp.lt.s32.totalorder %s46_s14, %s46_s14 }
  0x3f   :  { %p3650_p13 = scmp.ne.s32.totalorder %s46_s14, %s3649_s23  ;;  %p3655_p1 = scmp.lt.s32.totalorder %s3649_s23, %s3649_s23 }
  0x41   :  { %p3656_p2 = por %p3655_p1, %p3654_p0 }
  0x43   :  { %p3657_p3 = pnand %p3656_p2, %p3650_p13 }
  0x45   :  { %3660 = shalt.err (!%p3657_p3)
}
  0x46   :  { %s3747_s0 = smov 128   ;;  %s3748_s24 = smov 8  }
  0x47   :  { %51 = dma.hbm_to_vmem [thread:$0]  %s4457_s2, 8192, %s46_s14, [#allocation6], %s3747_s0, %s3747_s0, %s3748_s24  }
  0x48   :  { %s3749_s27 = smov [#allocation10]   ;;  %s3750_s29 = smov [#allocation11]  }
  0x49   :  { %s69_s28 = sshll.u32 %s3749_s27, 4  ;;  %s82_s30 = sshll.u32 %s3750_s29, 4  ;;  %s70_s28 = int_to_ptr.vmem [resolvable:$true] %s69_s28  ;;  %s83_s30 = int_to_ptr.vmem [resolvable:$true] %s82_s30 }
  0x4a   :  { %s3661_s9 = scalar_lea.hbm %s4459_s4, 1024 }
  0x4b   :  { %p3662_p4 = scmp.ne.s32.totalorder %s4459_s4, %s3661_s9  ;;  %p3665_p5 = scmp.lt.u32.totalorder %s3661_s9, %s4459_s4 }
  0x4d   :  { %p3667_p6 = pnand %p3665_p5, %p3662_p4 }
  0x4f   :  { %3670 = shalt.err (!%p3667_p6)
}
  0x50   :  { %s3671_s2 = scalar_lea.vmem %s70_s28, 1024  ;;  %p3676_p8 = scmp.lt.s32.totalorder %s70_s28, %s70_s28 }
  0x51   :  { %p3672_p7 = scmp.ne.s32.totalorder %s70_s28, %s3671_s2  ;;  %p3677_p9 = scmp.lt.s32.totalorder %s3671_s2, %s3671_s2 }
  0x53   :  { %p3678_p10 = por %p3677_p9, %p3676_p8 }
  0x55   :  { %p3679_p11 = pnand %p3678_p10, %p3672_p7 }
  0x57   :  { %3682 = shalt.err (!%p3679_p11)
}
  0x58   :  { %75 = dma.hbm_to_vmem [thread:$0]  %s4459_s4, 1024, %s70_s28, [#allocation9], %s3741_s1, %s3741_s1, %s3742_s21  }
  0x59   :  { %s3683_s17 = scalar_lea.hbm %s4460_s5, 512 }
  0x5a   :  { %p3684_p12 = scmp.ne.s32.totalorder %s4460_s5, %s3683_s17  ;;  %p3687_p13 = scmp.lt.u32.totalorder %s3683_s17, %s4460_s5 }
  0x5c   :  { %p3689_p0 = pnand %p3687_p13, %p3684_p12 }
  0x5e   :  { %3692 = shalt.err (!%p3689_p0)
}
  0x5f   :  { %s3693_s23 = scalar_lea.vmem %s83_s30, 512  ;;  %p3698_p2 = scmp.lt.s32.totalorder %s83_s30, %s83_s30 }
  0x60   :  { %p3694_p1 = scmp.ne.s32.totalorder %s83_s30, %s3693_s23  ;;  %p3699_p3 = scmp.lt.s32.totalorder %s3693_s23, %s3693_s23 }
  0x62   :  { %p3700_p4 = por %p3699_p3, %p3698_p2 }
  0x64   :  { %p3701_p5 = pnand %p3700_p4, %p3694_p1 }
  0x66   :  { %3704 = shalt.err (!%p3701_p5)
}
  0x67   :  { %85 = dma.hbm_to_vmem [thread:$0]  %s4460_s5, 512, %s83_s30, [#allocation12]  }
  0x68   :  { %3727 = dma.done.wait [#allocation3], 4096  }
  0x69   :  { %3728 = vsyncadd [#allocation3], 4294963200 }
  0x6a   :  { %3729 = dma.done.wait [#allocation6], 24320  }
  0x6b   :  { %3730 = vsyncadd [#allocation6], 4294942976 }
  0x6c   :  { %3731 = dma.done.wait [#allocation9], 3072  }
  0x6d   :  { %3732 = vsyncadd [#allocation9], 4294964224 }
  0x6e   :  { %3733 = dma.done.wait [#allocation12], 512  }
  0x6f   :  { %3734 = vsyncadd [#allocation12], 4294966784  ;;  %v3249_v0 = vld [vmem:[#allocation5 + $0x4] ss:$16 sps:$4 sm:$0xff]   ;;  %v3253_v2 = vld [vmem:[#allocation5] ss:$16 sps:$4 sm:$0xff]  }
  0x70   :  { %v3251_v1 = vld [vmem:[#allocation5 + $0x204] ss:$16 sps:$4 sm:$0xff]   ;;  %935 = vmatprep.subr.bf16.mxu1 %v3249_v0  ;;  %v3254_v3 = vld [vmem:[#allocation5 + $0x200] ss:$16 sps:$4 sm:$0xff]   ;;  %v106_v46 = vld [vmem:[#allocation2 + $0x8] sm:$0xff]  ;;  %vm909_vm0 = vcmask 949248  }
  0x71   :  { %1008 = vmatprep.subr.bf16.mxu0 %v3251_v1  ;;  %v3255_v4 = vld [vmem:[#allocation5 + $0x24] ss:$16 sps:$4 sm:$0xff]   ;;  %936 = vmatpush1.bf16.msra.mxu1 %v3253_v2  ;;  %v3259_v6 = vld [vmem:[#allocation5 + $0x20] ss:$16 sps:$4 sm:$0xff]   ;;  %v110_v47 = vld [vmem:[#allocation2 + $0x28] sm:$0xff]  ;;  %vm922_vm1 = vcmask 1041408  }
  0x72   :  { %1009 = vmatpush1.bf16.msra.mxu0 %v3254_v3  ;;  %v3257_v5 = vld [vmem:[#allocation5 + $0x224] ss:$16 sps:$4 sm:$0xff]   ;;  %937 = vmatprep.subr.bf16.mxu1 %v3255_v4  ;;  %v3260_v7 = vld [vmem:[#allocation5 + $0x220] ss:$16 sps:$4 sm:$0xff]   ;;  %v108_v48 = vld [vmem:[#allocation2 + $0x18] sm:$0xff]  ;;  %v3869_v51 = vpack.c.bf16 %v110_v47, %v106_v46  ;;  %s3752_s5 = smov [#allocation13]  }
  0x73   :  { %1010 = vmatprep.subr.bf16.mxu0 %v3257_v5  ;;  %v3261_v8 = vld [vmem:[#allocation5 + $0x44] ss:$16 sps:$4 sm:$0xff]   ;;  %v3265_v10 = vld [vmem:[#allocation5 + $0x40] ss:$16 sps:$4 sm:$0xff]   ;;  %v112_v49 = vld [vmem:[#allocation2 + $0x38] sm:$0xff]  ;;  %s2868_s21 = sshll.u32 %s3752_s5, 4  ;;  %s2869_s21 = int_to_ptr.vmem [resolvable:$true] %s2868_s21 }
  0x74   :  { %v3263_v9 = vld [vmem:[#allocation5 + $0x244] ss:$16 sps:$4 sm:$0xff]   ;;  %v3266_v11 = vld [vmem:[#allocation5 + $0x240] ss:$16 sps:$4 sm:$0xff]   ;;  %v3871_v52 = vpack.c.bf16 %v112_v49, %v108_v48  ;;  %967 = vmatprep.mubr.bf16.mxu1 %v3869_v51  ;;  %v134_v46 = vld [vmem:[#allocation2 + $0xe8] sm:$0xff]  ;;  %s3705_s25 = scalar_lea.vmem %s2869_s21, 1024  ;;  %p3710_p7 = scmp.lt.s32.totalorder %s2869_s21, %s2869_s21 }
  0x75   :  { %938 = vmatpush1.bf16.msra.mxu1 %v3259_v6  ;;  %v3267_v12 = vld [vmem:[#allocation5 + $0x64] ss:$16 sps:$4 sm:$0xff]   ;;  %v3271_v14 = vld [vmem:[#allocation5 + $0x60] ss:$16 sps:$4 sm:$0xff]   ;;  %v132_v47 = vld [vmem:[#allocation2 + $0xd8] sm:$0xff]  ;;  %p3706_p6 = scmp.ne.s32.totalorder %s2869_s21, %s3705_s25  ;;  %p3711_p8 = scmp.lt.s32.totalorder %s3705_s25, %s3705_s25 }
  0x76   :  { %1011 = vmatpush1.bf16.msra.mxu0 %v3260_v7  ;;  %939 = vmatprep.subr.bf16.mxu1 %v3261_v8  ;;  %v3269_v13 = vld [vmem:[#allocation5 + $0x264] ss:$16 sps:$4 sm:$0xff]   ;;  %v3272_v15 = vld [vmem:[#allocation5 + $0x260] ss:$16 sps:$4 sm:$0xff]   ;;  %v136_v48 = vld [vmem:[#allocation2 + $0xf8] sm:$0xff] }
  0x77   :  { %1012 = vmatprep.subr.bf16.mxu0 %v3263_v9  ;;  %v3273_v16 = vld [vmem:[#allocation5 + $0x84] ss:$16 sps:$4 sm:$0xff]   ;;  %v3277_v18 = vld [vmem:[#allocation5 + $0x80] ss:$16 sps:$4 sm:$0xff]   ;;  %3012 = vmatprep.mubr.msk.bf16.mxu0 %vm909_vm0, %v3871_v52  ;;  %p3712_p9 = por %p3711_p8, %p3710_p7 }
  0x78   :  { %v3275_v17 = vld [vmem:[#allocation5 + $0x284] ss:$16 sps:$4 sm:$0xff]   ;;  %v3278_v19 = vld [vmem:[#allocation5 + $0x280] ss:$16 sps:$4 sm:$0xff]  }
  0x79   :  { %940 = vmatpush1.bf16.msra.mxu1 %v3265_v10  ;;  %v3279_v20 = vld [vmem:[#allocation5 + $0xa4] ss:$16 sps:$4 sm:$0xff]   ;;  %v3283_v22 = vld [vmem:[#allocation5 + $0xa0] ss:$16 sps:$4 sm:$0xff]   ;;  %p3713_p10 = pnand %p3712_p9, %p3706_p6 }
  0x7a   :  { %1013 = vmatpush1.bf16.msra.mxu0 %v3266_v11  ;;  %941 = vmatprep.subr.bf16.mxu1 %v3267_v12  ;;  %v3281_v21 = vld [vmem:[#allocation5 + $0x2a4] ss:$16 sps:$4 sm:$0xff]   ;;  %v3284_v23 = vld [vmem:[#allocation5 + $0x2a0] ss:$16 sps:$4 sm:$0xff]   ;;  %v3346_v11 = vld [vmem:[#allocation5 + $0xc] ss:$16 sps:$4 sm:$0xff]  }
  0x7b   :  { %1014 = vmatprep.subr.bf16.mxu0 %v3269_v13  ;;  %v3285_v24 = vld [vmem:[#allocation5 + $0xc4] ss:$16 sps:$4 sm:$0xff]   ;;  %v3289_v26 = vld [vmem:[#allocation5 + $0xc0] ss:$16 sps:$4 sm:$0xff]   ;;  %v114_v13 = vld [vmem:[#allocation2 + $0x48] sm:$0xff] }
  0x7c   :  { %v3287_v25 = vld [vmem:[#allocation5 + $0x2c4] ss:$16 sps:$4 sm:$0xff]   ;;  %v3290_v27 = vld [vmem:[#allocation5 + $0x2c0] ss:$16 sps:$4 sm:$0xff]  }
  0x7d   :  { %942 = vmatpush1.bf16.msra.mxu1 %v3271_v14  ;;  %v3291_v28 = vld [vmem:[#allocation5 + $0xe4] ss:$16 sps:$4 sm:$0xff]   ;;  %v3295_v30 = vld [vmem:[#allocation5 + $0xe0] ss:$16 sps:$4 sm:$0xff]   ;;  %v118_v14 = vld [vmem:[#allocation2 + $0x68] sm:$0xff] }
  0x7e   :  { %1015 = vmatpush1.bf16.msra.mxu0 %v3272_v15  ;;  %943 = vmatprep.subr.bf16.mxu1 %v3273_v16  ;;  %v3293_v29 = vld [vmem:[#allocation5 + $0x2e4] ss:$16 sps:$4 sm:$0xff]   ;;  %v3296_v31 = vld [vmem:[#allocation5 + $0x2e0] ss:$16 sps:$4 sm:$0xff]   ;;  %v116_v15 = vld [vmem:[#allocation2 + $0x58] sm:$0xff] }
  0x7f   :  { %1016 = vmatprep.subr.bf16.mxu0 %v3275_v17  ;;  %v3297_v32 = vld [vmem:[#allocation5 + $0x104] ss:$16 sps:$4 sm:$0xff]   ;;  %v3301_v34 = vld [vmem:[#allocation5 + $0x100] ss:$16 sps:$4 sm:$0xff]   ;;  %v120_v16 = vld [vmem:[#allocation2 + $0x78] sm:$0xff] }
  0x80   :  { %v3299_v33 = vld [vmem:[#allocation5 + $0x304] ss:$16 sps:$4 sm:$0xff]   ;;  %v3302_v35 = vld [vmem:[#allocation5 + $0x300] ss:$16 sps:$4 sm:$0xff]  }
  0x81   :  { %944 = vmatpush1.bf16.msra.mxu1 %v3277_v18  ;;  %v3303_v36 = vld [vmem:[#allocation5 + $0x124] ss:$16 sps:$4 sm:$0xff]   ;;  %v3307_v38 = vld [vmem:[#allocation5 + $0x120] ss:$16 sps:$4 sm:$0xff]  }
  0x82   :  { %1017 = vmatpush1.bf16.msra.mxu0 %v3278_v19  ;;  %945 = vmatprep.subr.bf16.mxu1 %v3279_v20  ;;  %v3305_v37 = vld [vmem:[#allocation5 + $0x324] ss:$16 sps:$4 sm:$0xff]   ;;  %v3308_v39 = vld [vmem:[#allocation5 + $0x320] ss:$16 sps:$4 sm:$0xff]   ;;  %v3344_v19 = vld [vmem:[#allocation5 + $0x8] ss:$16 sps:$4 sm:$0xff]   ;;  %v3882_v20 = vpack.c.bf16 %v118_v14, %v114_v13 }
  0x83   :  { %1018 = vmatprep.subr.bf16.mxu0 %v3281_v21  ;;  %v3309_v40 = vld [vmem:[#allocation5 + $0x144] ss:$16 sps:$4 sm:$0xff]   ;;  %v3313_v42 = vld [vmem:[#allocation5 + $0x140] ss:$16 sps:$4 sm:$0xff]   ;;  %v3349_v21 = vld [vmem:[#allocation5 + $0x2c] ss:$16 sps:$4 sm:$0xff]  }
  0x84   :  { %v3311_v41 = vld [vmem:[#allocation5 + $0x344] ss:$16 sps:$4 sm:$0xff]   ;;  %v3314_v43 = vld [vmem:[#allocation5 + $0x340] ss:$16 sps:$4 sm:$0xff]   ;;  %v3380_v13 = vld [vmem:[#allocation5 + $0x188] ss:$16 sps:$4 sm:$0xff]  }
  0x85   :  { %946 = vmatpush1.bf16.msra.mxu1 %v3283_v22  ;;  %v3315_v44 = vld [vmem:[#allocation5 + $0x164] ss:$16 sps:$4 sm:$0xff]   ;;  %v3319_v50 = vld [vmem:[#allocation5 + $0x160] ss:$16 sps:$4 sm:$0xff]   ;;  %v3884_v22 = vpack.c.bf16 %v120_v16, %v116_v15  ;;  %v3383_v14 = vld [vmem:[#allocation5 + $0x1a8] ss:$16 sps:$4 sm:$0xff]  }
  0x86   :  { %1019 = vmatpush1.bf16.msra.mxu0 %v3284_v23  ;;  %947 = vmatprep.subr.bf16.mxu1 %v3285_v24  ;;  %v3317_v45 = vld [vmem:[#allocation5 + $0x364] ss:$16 sps:$4 sm:$0xff]   ;;  %v3320_v53 = vld [vmem:[#allocation5 + $0x360] ss:$16 sps:$4 sm:$0xff]   ;;  %v3347_v23 = vld [vmem:[#allocation5 + $0x28] ss:$16 sps:$4 sm:$0xff]  }
  0x87   :  { %1020 = vmatprep.subr.bf16.mxu0 %v3287_v25  ;;  %v3321_v54 = vld [vmem:[#allocation5 + $0x184] ss:$16 sps:$4 sm:$0xff]   ;;  %v3325_v56 = vld [vmem:[#allocation5 + $0x180] ss:$16 sps:$4 sm:$0xff]   ;;  %v3388_v15 = vld [vmem:[#allocation5 + $0x1cc] ss:$16 sps:$4 sm:$0xff]  }
  0x88   :  { %v3323_v55 = vld [vmem:[#allocation5 + $0x384] ss:$16 sps:$4 sm:$0xff]   ;;  %v3326_v57 = vld [vmem:[#allocation5 + $0x380] ss:$16 sps:$4 sm:$0xff]   ;;  %v3386_v16 = vld [vmem:[#allocation5 + $0x1c8] ss:$16 sps:$4 sm:$0xff]  }
  0x89   :  { %948 = vmatpush1.bf16.msra.mxu1 %v3289_v26  ;;  %v3327_v58 = vld [vmem:[#allocation5 + $0x1a4] ss:$16 sps:$4 sm:$0xff]   ;;  %v3331_v60 = vld [vmem:[#allocation5 + $0x1a0] ss:$16 sps:$4 sm:$0xff]  }
  0x8a   :  { %1021 = vmatpush1.bf16.msra.mxu0 %v3290_v27  ;;  %949 = vmatprep.subr.bf16.mxu1 %v3291_v28  ;;  %v3329_v59 = vld [vmem:[#allocation5 + $0x3a4] ss:$16 sps:$4 sm:$0xff]   ;;  %v3332_v61 = vld [vmem:[#allocation5 + $0x3a0] ss:$16 sps:$4 sm:$0xff]   ;;  %v3352_v28 = vld [vmem:[#allocation5 + $0x4c] ss:$16 sps:$4 sm:$0xff]  }
  0x8b   :  { %1022 = vmatprep.subr.bf16.mxu0 %v3293_v29  ;;  %v3333_v62 = vld [vmem:[#allocation5 + $0x1c4] ss:$16 sps:$4 sm:$0xff]   ;;  %v3337_v1 = vld [vmem:[#allocation5 + $0x1c0] ss:$16 sps:$4 sm:$0xff]   ;;  %v122_v29 = vld [vmem:[#allocation2 + $0x88] sm:$0xff] }
  0x8c   :  { %v3335_v63 = vld [vmem:[#allocation5 + $0x3c4] ss:$16 sps:$4 sm:$0xff]   ;;  %v3338_v2 = vld [vmem:[#allocation5 + $0x3c0] ss:$16 sps:$4 sm:$0xff]  }
  0x8d   :  { %950 = vmatpush1.bf16.msra.mxu1 %v3295_v30  ;;  %v277_v0 = vld [vmem:[#allocation5 + $0x3e0] sm:$0x33]  ;;  %v107_v9 = vld [vmem:[#allocation2 + $0x10] sm:$0xff]  ;;  %v126_v30 = vld [vmem:[#allocation2 + $0xa8] sm:$0xff] }
  0x8e   :  { %1023 = vmatpush1.bf16.msra.mxu0 %v3296_v31  ;;  %951 = vmatprep.subr.bf16.mxu1 %v3297_v32  ;;  %v3339_v3 = vld [vmem:[#allocation5 + $0x1e4] ss:$16 sps:$4 sm:$0xff]   ;;  %v3008_v4 = vcombine.high %v277_v0, %v277_v0  ;;  %v3007_v5 = vcombine.low %v277_v0, %v277_v0  ;;  %v3342_v6 = vld [vmem:[#allocation5 + $0x1e0] ss:$16 sps:$4 sm:$0xff]   ;;  %v124_v31 = vld [vmem:[#allocation2 + $0x98] sm:$0xff] }
  0x8f   :  { %1024 = vmatprep.subr.bf16.mxu0 %v3299_v33  ;;  %v105_v7 = vld [vmem:[#allocation2] sm:$0xff]  ;;  %v111_v10 = vld [vmem:[#allocation2 + $0x30] sm:$0xff]  ;;  %v128_v32 = vld [vmem:[#allocation2 + $0xb8] sm:$0xff] }
  0x90   :  { %v109_v8 = vld [vmem:[#allocation2 + $0x20] sm:$0xff]  ;;  %v924_v12 = vsel %vm922_vm1, %v3007_v5, 0  ;;  %v3880_v18 = vpack.c.bf16 %v111_v10, %v107_v9  ;;  %v115_v26 = vld [vmem:[#allocation2 + $0x50] sm:$0xff]  ;;  %v3368_v5 = vld [vmem:[#allocation5 + $0x108] ss:$16 sps:$4 sm:$0xff]  }
  0x91   :  { %952 = vmatpush1.bf16.msra.mxu1 %v3301_v34  ;;  %v3878_v17 = vpack.c.bf16 %v109_v8, %v105_v7  ;;  %v113_v24 = vld [vmem:[#allocation2 + $0x40] sm:$0xff]  ;;  %v119_v27 = vld [vmem:[#allocation2 + $0x70] sm:$0xff]  ;;  %v3371_v7 = vld [vmem:[#allocation5 + $0x128] ss:$16 sps:$4 sm:$0xff]  }
  0x92   :  { %1025 = vmatpush1.bf16.msra.mxu0 %v3302_v35  ;;  %953 = vmatprep.subr.bf16.mxu1 %v3303_v36  ;;  %v117_v25 = vld [vmem:[#allocation2 + $0x60] sm:$0xff]  ;;  %v3893_v34 = vpack.c.bf16 %v119_v27, %v115_v26  ;;  %v3350_v35 = vld [vmem:[#allocation5 + $0x48] ss:$16 sps:$4 sm:$0xff]   ;;  %v3895_v36 = vpack.c.bf16 %v126_v30, %v122_v29  ;;  %v3376_v8 = vld [vmem:[#allocation5 + $0x14c] ss:$16 sps:$4 sm:$0xff]  }
  0x93   :  { %1026 = vmatprep.subr.bf16.mxu0 %v3305_v37  ;;  %v3891_v33 = vpack.c.bf16 %v117_v25, %v113_v24  ;;  %v3355_v37 = vld [vmem:[#allocation5 + $0x6c] ss:$16 sps:$4 sm:$0xff]   ;;  %v3374_v9 = vld [vmem:[#allocation5 + $0x148] ss:$16 sps:$4 sm:$0xff]  }
  0x94   :  { %v3379_v10 = vld [vmem:[#allocation5 + $0x16c] ss:$16 sps:$4 sm:$0xff]   ;;  %v3392_v24 = vld [vmem:[#allocation5 + $0x208] ss:$16 sps:$4 sm:$0xff]  }
  0x95   :  { %954 = vmatpush1.bf16.msra.mxu1 %v3307_v38  ;;  %v3897_v38 = vpack.c.bf16 %v128_v32, %v124_v31  ;;  %v3397_v25 = vld [vmem:[#allocation5 + $0x22c] ss:$16 sps:$4 sm:$0xff]   ;;  %v3395_v26 = vld [vmem:[#allocation5 + $0x228] ss:$16 sps:$4 sm:$0xff]  }
  0x96   :  { %1027 = vmatpush1.bf16.msra.mxu0 %v3308_v39  ;;  %955 = vmatprep.subr.bf16.mxu1 %v3309_v40  ;;  %v3353_v39 = vld [vmem:[#allocation5 + $0x68] ss:$16 sps:$4 sm:$0xff]   ;;  %v121_v40 = vld [vmem:[#allocation2 + $0x80] sm:$0xff]  ;;  %v3400_v27 = vld [vmem:[#allocation5 + $0x24c] ss:$16 sps:$4 sm:$0xff]  }
  0x97   :  { %1028 = vmatprep.subr.bf16.mxu0 %v3311_v41  ;;  %v125_v41 = vld [vmem:[#allocation2 + $0xa0] sm:$0xff]  ;;  %v3403_v29 = vld [vmem:[#allocation5 + $0x26c] ss:$16 sps:$4 sm:$0xff]   ;;  %v3401_v30 = vld [vmem:[#allocation5 + $0x268] ss:$16 sps:$4 sm:$0xff]  }
  0x98   :  { %v3904_v49 = vpack.c.bf16 %v125_v41, %v121_v40  ;;  %v3406_v31 = vld [vmem:[#allocation5 + $0x28c] ss:$16 sps:$4 sm:$0xff]   ;;  %v3416_v40 = vld [vmem:[#allocation5 + $0x308] ss:$16 sps:$4 sm:$0xff]  }
  0x99   :  { %956 = vmatpush1.bf16.msra.mxu1 %v3313_v42  ;;  %v123_v42 = vld [vmem:[#allocation2 + $0x90] sm:$0xff]  ;;  %v3409_v32 = vld [vmem:[#allocation5 + $0x2ac] ss:$16 sps:$4 sm:$0xff]  }
  0x9a   :  { %1029 = vmatpush1.bf16.msra.mxu0 %v3314_v43  ;;  %957 = vmatprep.subr.bf16.mxu1 %v3315_v44  ;;  %v127_v43 = vld [vmem:[#allocation2 + $0xb0] sm:$0xff]  ;;  %v3358_v44 = vld [vmem:[#allocation5 + $0x8c] ss:$16 sps:$4 sm:$0xff]  }
  0x9b   :  { %1030 = vmatprep.subr.bf16.mxu0 %v3317_v45  ;;  %v130_v45 = vld [vmem:[#allocation2 + $0xc8] sm:$0xff] }
  0x9c   :  { %v3421_v41 = vld [vmem:[#allocation5 + $0x32c] ss:$16 sps:$4 sm:$0xff]  }
  0x9d   :  { %958 = vmatpush1.bf16.msra.mxu1 %v3319_v50  ;;  %v3906_v50 = vpack.c.bf16 %v127_v43, %v123_v42  ;;  %v3419_v42 = vld [vmem:[#allocation5 + $0x328] ss:$16 sps:$4 sm:$0xff]   ;;  %v3424_v43 = vld [vmem:[#allocation5 + $0x34c] ss:$16 sps:$4 sm:$0xff]  }
  0x9e   :  { %1031 = vmatpush1.bf16.msra.mxu0 %v3320_v53  ;;  %959 = vmatprep.subr.bf16.mxu1 %v3321_v54  ;;  %v3356_v53 = vld [vmem:[#allocation5 + $0x88] ss:$16 sps:$4 sm:$0xff]   ;;  %v3908_v54 = vpack.c.bf16 %v134_v46, %v130_v45  ;;  %v3427_v45 = vld [vmem:[#allocation5 + $0x36c] ss:$16 sps:$4 sm:$0xff]  }
  0x9f   :  { %1032 = vmatprep.subr.bf16.mxu0 %v3323_v55  ;;  %v3361_v55 = vld [vmem:[#allocation5 + $0xac] ss:$16 sps:$4 sm:$0xff]   ;;  %v3425_v46 = vld [vmem:[#allocation5 + $0x368] ss:$16 sps:$4 sm:$0xff]  }
  0xa1   :  { %960 = vmatpush1.bf16.msra.mxu1 %v3325_v56  ;;  %v3910_v56 = vpack.c.bf16 %v136_v48, %v132_v47  ;;  %v3430_v47 = vld [vmem:[#allocation5 + $0x38c] ss:$16 sps:$4 sm:$0xff]  }
  0xa2   :  { %1033 = vmatpush1.bf16.msra.mxu0 %v3326_v57  ;;  %961 = vmatprep.subr.bf16.mxu1 %v3327_v58  ;;  %v3359_v57 = vld [vmem:[#allocation5 + $0xa8] ss:$16 sps:$4 sm:$0xff]   ;;  %v129_v58 = vld [vmem:[#allocation2 + $0xc0] sm:$0xff]  ;;  %v3433_v48 = vld [vmem:[#allocation5 + $0x3ac] ss:$16 sps:$4 sm:$0xff]  }
  0xa3   :  { %1034 = vmatprep.subr.bf16.mxu0 %v3329_v59  ;;  %v133_v59 = vld [vmem:[#allocation2 + $0xe0] sm:$0xff] }
  0xa5   :  { %962 = vmatpush1.bf16.msra.mxu1 %v3331_v60  ;;  %v131_v60 = vld [vmem:[#allocation2 + $0xd0] sm:$0xff] }
  0xa6   :  { %1035 = vmatpush1.bf16.msra.mxu0 %v3332_v61  ;;  %963 = vmatprep.subr.bf16.mxu1 %v3333_v62  ;;  %v135_v61 = vld [vmem:[#allocation2 + $0xf0] sm:$0xff]  ;;  %v3364_v62 = vld [vmem:[#allocation5 + $0xcc] ss:$16 sps:$4 sm:$0xff]  }
  0xa7   :  { %1036 = vmatprep.subr.bf16.mxu0 %v3335_v63  ;;  %v3917_v63 = vpack.c.bf16 %v133_v59, %v129_v58  ;;  %v3919_v0 = vpack.c.bf16 %v135_v61, %v131_v60 }
  0xa9   :  { %964 = vmatpush1.bf16.msra.mxu1 %v3337_v1  ;;  %v3362_v1 = vld [vmem:[#allocation5 + $0xc8] ss:$16 sps:$4 sm:$0xff]  }
  0xaa   :  { %1037 = vmatpush1.bf16.msra.mxu0 %v3338_v2  ;;  %965 = vmatprep.subr.bf16.mxu1 %v3339_v3  ;;  %v3367_v2 = vld [vmem:[#allocation5 + $0xec] ss:$16 sps:$4 sm:$0xff]   ;;  %v3365_v3 = vld [vmem:[#allocation5 + $0xe8] ss:$16 sps:$4 sm:$0xff]  }
  0xab   :  { %3011 = vmatprep.subr.msk.bf16.mxu0 %vm922_vm1, %v3008_v4  ;;  %v3370_v4 = vld [vmem:[#allocation5 + $0x10c] ss:$16 sps:$4 sm:$0xff]  }
  0xad   :  { %966 = vmatpush1.bf16.msra.mxu1 %v3342_v6  ;;  %v3373_v6 = vld [vmem:[#allocation5 + $0x12c] ss:$16 sps:$4 sm:$0xff]  }
  0xae   :  { %1039 = vmatpush1.bf16.msra.mxu0 %v924_v12  ;;  %1081 = vmatprep.subr.bf16.mxu1 %v3346_v11  ;;  %v3377_v11 = vld [vmem:[#allocation5 + $0x168] ss:$16 sps:$4 sm:$0xff]   ;;  %v3382_v12 = vld [vmem:[#allocation5 + $0x18c] ss:$16 sps:$4 sm:$0xff]  }
  0xb0   :  { %968 = vmatmul.mubr.bf16.vlgmr.msra.gmra.mrb[0].mxu1 %v3878_v17 }
  0xb1   :  { %1041 = vmatmul.mubr.bf16.vlgmr.msra.gmra.mrb[0].mxu0 %v3880_v18  ;;  %1082 = vmatpush1.bf16.msra.mxu1 %v3344_v19  ;;  %v3391_v19 = vld [vmem:[#allocation5 + $0x1ec] ss:$16 sps:$4 sm:$0xff]  }
  0xb2   :  { %977 = vmatprep.mubr.bf16.mxu1 %v3882_v20  ;;  %1083 = vmatprep.subr.bf16.mxu1 %v3349_v21  ;;  %v3389_v21 = vld [vmem:[#allocation5 + $0x1e8] ss:$16 sps:$4 sm:$0xff]  }
  0xb3   :  { %3013 = vmatprep.mubr.msk.bf16.mxu0 %vm909_vm0, %v3884_v22 }
  0xb5   :  { %1084 = vmatpush1.bf16.msra.mxu1 %v3347_v23  ;;  %v3394_v23 = vld [vmem:[#allocation5 + $0x20c] ss:$16 sps:$4 sm:$0xff]  }
  0xb6   :  { %1085 = vmatprep.subr.bf16.mxu1 %v3352_v28  ;;  %v3398_v28 = vld [vmem:[#allocation5 + $0x248] ss:$16 sps:$4 sm:$0xff]  }
  0xb8   :  { %978 = vmatmul.mubr.bf16.gmra.mrb[4].mxu1 %v3891_v33 }
  0xb9   :  { %1051 = vmatmul.mubr.bf16.gmra.mrb[4].mxu0 %v3893_v34  ;;  %1086 = vmatpush1.bf16.msra.mxu1 %v3350_v35  ;;  %v3412_v35 = vld [vmem:[#allocation5 + $0x2cc] ss:$16 sps:$4 sm:$0xff]  }
  0xba   :  { %987 = vmatprep.mubr.bf16.mxu1 %v3895_v36  ;;  %1087 = vmatprep.subr.bf16.mxu1 %v3355_v37  ;;  %v3415_v37 = vld [vmem:[#allocation5 + $0x2ec] ss:$16 sps:$4 sm:$0xff]  }
  0xbb   :  { %3014 = vmatprep.mubr.msk.bf16.mxu0 %vm909_vm0, %v3897_v38 }
  0xbd   :  { %1088 = vmatpush1.bf16.msra.mxu1 %v3353_v39  ;;  %v3418_v39 = vld [vmem:[#allocation5 + $0x30c] ss:$16 sps:$4 sm:$0xff]  }
  0xbe   :  { %1089 = vmatprep.subr.bf16.mxu1 %v3358_v44  ;;  %v3422_v44 = vld [vmem:[#allocation5 + $0x348] ss:$16 sps:$4 sm:$0xff]  }
  0xc0   :  { %988 = vmatmul.mubr.bf16.gmra.mrb[8].mxu1 %v3904_v49 }
  0xc1   :  { %1061 = vmatmul.mubr.bf16.gmra.mrb[8].mxu0 %v3906_v50  ;;  %1090 = vmatpush1.bf16.msra.mxu1 %v3356_v53  ;;  %v3436_v53 = vld [vmem:[#allocation5 + $0x3cc] ss:$16 sps:$4 sm:$0xff]  }
  0xc2   :  { %997 = vmatprep.mubr.bf16.mxu1 %v3908_v54  ;;  %1091 = vmatprep.subr.bf16.mxu1 %v3361_v55  ;;  %v3434_v55 = vld [vmem:[#allocation5 + $0x3c8] ss:$16 sps:$4 sm:$0xff]  }
  0xc3   :  { %3015 = vmatprep.mubr.msk.bf16.mxu0 %vm909_vm0, %v3910_v56 }
  0xc5   :  { %1092 = vmatpush1.bf16.msra.mxu1 %v3359_v57 }
  0xc6   :  { %1093 = vmatprep.subr.bf16.mxu1 %v3364_v62 }
  0xc8   :  { %998 = vmatmul.mubr.bf16.gmra.mrb[12].mxu1 %v3917_v63 }
  0xc9   :  { %1071 = vmatmul.mubr.bf16.gmra.mrb[12].mxu0 %v3919_v0  ;;  %1094 = vmatpush1.bf16.msra.mxu1 %v3362_v1 }
  0xca   :  { %1113 = vmatprep.mubr.bf16.mxu1 %v3869_v51  ;;  %1095 = vmatprep.subr.bf16.mxu1 %v3367_v2  ;;  %v3385_v51 = vld [vmem:[#allocation5 + $0x1ac] ss:$16 sps:$4 sm:$0xff]  }
  0xcd   :  { %1096 = vmatpush1.bf16.msra.mxu1 %v3365_v3 }
  0xce   :  { %1097 = vmatprep.subr.bf16.mxu1 %v3370_v4 }
  0xd1   :  { %1098 = vmatpush1.bf16.msra.mxu1 %v3368_v5 }
  0xd2   :  { %1099 = vmatprep.subr.bf16.mxu1 %v3373_v6 }
  0xd5   :  { %1100 = vmatpush1.bf16.msra.mxu1 %v3371_v7 }
  0xd6   :  { %1101 = vmatprep.subr.bf16.mxu1 %v3376_v8 }
  0xd9   :  { %1102 = vmatpush1.bf16.msra.mxu1 %v3374_v9 }
  0xda   :  { %1103 = vmatprep.subr.bf16.mxu1 %v3379_v10 }
  0xdd   :  { %1104 = vmatpush1.bf16.msra.mxu1 %v3377_v11 }
  0xde   :  { %1105 = vmatprep.subr.bf16.mxu1 %v3382_v12 }
  0xe1   :  { %1106 = vmatpush1.bf16.msra.mxu1 %v3380_v13 }
  0xe2   :  { %1107 = vmatprep.subr.bf16.mxu1 %v3385_v51 }
  0xe5   :  { %1108 = vmatpush1.bf16.msra.mxu1 %v3383_v14 }
  0xe6   :  { %1109 = vmatprep.subr.bf16.mxu1 %v3388_v15 }
  0xe9   :  { %1110 = vmatpush1.bf16.msra.mxu1 %v3386_v16 }
  0xea   :  { %1111 = vmatprep.subr.bf16.mxu1 %v3391_v19 }
  0xed   :  { %1112 = vmatpush1.bf16.msra.mxu1 %v3389_v21 }
  0xee   :  { %1154 = vmatprep.subr.bf16.mxu1 %v3394_v23 }
  0xf0   :  { %1114 = vmatmul.mubr.bf16.vlgmr.msra.gmra.mrb[16].mxu1 %v3878_v17  ;;  %v3404_v17 = vld [vmem:[#allocation5 + $0x288] ss:$16 sps:$4 sm:$0xff]  }
  0xf1   :  { %1155 = vmatpush1.bf16.msra.mxu1 %v3392_v24  ;;  %1123 = vmatprep.mubr.bf16.mxu1 %v3882_v20  ;;  %v3407_v20 = vld [vmem:[#allocation5 + $0x2a8] ss:$16 sps:$4 sm:$0xff]  }
  0xf2   :  { %1156 = vmatprep.subr.bf16.mxu1 %v3397_v25 }
  0xf5   :  { %1157 = vmatpush1.bf16.msra.mxu1 %v3395_v26 }
  0xf6   :  { %1158 = vmatprep.subr.bf16.mxu1 %v3400_v27 }
  0xf8   :  { %1124 = vmatmul.mubr.bf16.gmra.mrb[20].mxu1 %v3891_v33  ;;  %v3410_v33 = vld [vmem:[#allocation5 + $0x2c8] ss:$16 sps:$4 sm:$0xff]  }
  0xf9   :  { %1159 = vmatpush1.bf16.msra.mxu1 %v3398_v28  ;;  %1133 = vmatprep.mubr.bf16.mxu1 %v3895_v36  ;;  %v3413_v36 = vld [vmem:[#allocation5 + $0x2e8] ss:$16 sps:$4 sm:$0xff]  }
  0xfa   :  { %1160 = vmatprep.subr.bf16.mxu1 %v3403_v29 }
  0xfd   :  { %1161 = vmatpush1.bf16.msra.mxu1 %v3401_v30 }
  0xfe   :  { %1162 = vmatprep.subr.bf16.mxu1 %v3406_v31 }
 0x100   :  { %1134 = vmatmul.mubr.bf16.gmra.mrb[24].mxu1 %v3904_v49  ;;  %v3431_v49 = vld [vmem:[#allocation5 + $0x3a8] ss:$16 sps:$4 sm:$0xff]  }
 0x101   :  { %1163 = vmatpush1.bf16.msra.mxu1 %v3404_v17  ;;  %1143 = vmatprep.mubr.bf16.mxu1 %v3908_v54  ;;  %v278_v54 = vld [vmem:[#allocation5 + $0x3e8] sm:$0x33] }
 0x102   :  { %1164 = vmatprep.subr.bf16.mxu1 %v3409_v32  ;;  %v3010_v57 = vcombine.high %v278_v54, %v278_v54  ;;  %v3009_v58 = vcombine.low %v278_v54, %v278_v54  ;;  %v3456_v54 = vld [vmem:[#allocation7 + $0x54] ss:$8 sps:$4 sm:$0xff]  }
 0x104   :  { %v930_v59 = vsel %vm922_vm1, %v3009_v58, 0  ;;  %v3462_v58 = vld [vmem:[#allocation7 + $0x74] ss:$8 sps:$4 sm:$0xff]  }
 0x105   :  { %1165 = vmatpush1.bf16.msra.mxu1 %v3407_v20 }
 0x106   :  { %1166 = vmatprep.subr.bf16.mxu1 %v3412_v35 }
 0x108   :  { %1144 = vmatmul.mubr.bf16.gmra.mrb[28].mxu1 %v3917_v63 }
 0x109   :  { %1167 = vmatpush1.bf16.msra.mxu1 %v3410_v33  ;;  %3017 = vmatprep.mubr.msk.bf16.mxu1 %vm909_vm0, %v3871_v52  ;;  %v3428_v52 = vld [vmem:[#allocation5 + $0x388] ss:$16 sps:$4 sm:$0xff]  }
 0x10a   :  { %1168 = vmatprep.subr.bf16.mxu1 %v3415_v37 }
 0x10d   :  { %1169 = vmatpush1.bf16.msra.mxu1 %v3413_v36 }
 0x10e   :  { %1170 = vmatprep.subr.bf16.mxu1 %v3418_v39 }
 0x111   :  { %1171 = vmatpush1.bf16.msra.mxu1 %v3416_v40 }
 0x112   :  { %1172 = vmatprep.subr.bf16.mxu1 %v3421_v41  ;;  %v3441_v41 = vld [vmem:[#allocation7 + $0x4] ss:$8 sps:$4 sm:$0xff]  }
 0x113   :  { %2060 = vmatprep.subr.bf16.mxu0 %v3441_v41 }
 0x115   :  { %1173 = vmatpush1.bf16.msra.mxu1 %v3419_v42  ;;  %v3439_v42 = vld [vmem:[#allocation7] ss:$8 sps:$4 sm:$0xff]  }
 0x116   :  { %1174 = vmatprep.subr.bf16.mxu1 %v3424_v43  ;;  %2061 = vmatpush1.bf16.msra.mxu0 %v3439_v42  ;;  %v3444_v43 = vld [vmem:[#allocation7 + $0x14] ss:$8 sps:$4 sm:$0xff]  }
 0x117   :  { %2062 = vmatprep.subr.bf16.mxu0 %v3444_v43 }
 0x119   :  { %1175 = vmatpush1.bf16.msra.mxu1 %v3422_v44  ;;  %v3442_v44 = vld [vmem:[#allocation7 + $0x10] ss:$8 sps:$4 sm:$0xff]  }
 0x11a   :  { %1176 = vmatprep.subr.bf16.mxu1 %v3427_v45  ;;  %2063 = vmatpush1.bf16.msra.mxu0 %v3442_v44  ;;  %v3447_v45 = vld [vmem:[#allocation7 + $0x24] ss:$8 sps:$4 sm:$0xff]  }
 0x11b   :  { %2064 = vmatprep.subr.bf16.mxu0 %v3447_v45 }
 0x11d   :  { %1177 = vmatpush1.bf16.msra.mxu1 %v3425_v46  ;;  %v3445_v46 = vld [vmem:[#allocation7 + $0x20] ss:$8 sps:$4 sm:$0xff]  }
 0x11e   :  { %1178 = vmatprep.subr.bf16.mxu1 %v3430_v47  ;;  %2065 = vmatpush1.bf16.msra.mxu0 %v3445_v46  ;;  %v3450_v47 = vld [vmem:[#allocation7 + $0x34] ss:$8 sps:$4 sm:$0xff]  }
 0x11f   :  { %2066 = vmatprep.subr.bf16.mxu0 %v3450_v47 }
 0x121   :  { %1179 = vmatpush1.bf16.msra.mxu1 %v3428_v52  ;;  %v3448_v52 = vld [vmem:[#allocation7 + $0x30] ss:$8 sps:$4 sm:$0xff]  }
 0x122   :  { %1180 = vmatprep.subr.bf16.mxu1 %v3433_v48  ;;  %2067 = vmatpush1.bf16.msra.mxu0 %v3448_v52  ;;  %v3453_v48 = vld [vmem:[#allocation7 + $0x44] ss:$8 sps:$4 sm:$0xff]  }
 0x123   :  { %2068 = vmatprep.subr.bf16.mxu0 %v3453_v48 }
 0x125   :  { %1181 = vmatpush1.bf16.msra.mxu1 %v3431_v49  ;;  %v3451_v49 = vld [vmem:[#allocation7 + $0x40] ss:$8 sps:$4 sm:$0xff]  }
 0x126   :  { %1182 = vmatprep.subr.bf16.mxu1 %v3436_v53  ;;  %2069 = vmatpush1.bf16.msra.mxu0 %v3451_v49  ;;  %v3454_v53 = vld [vmem:[#allocation7 + $0x50] ss:$8 sps:$4 sm:$0xff]  }
 0x127   :  { %2070 = vmatprep.subr.bf16.mxu0 %v3456_v54 }
 0x129   :  { %1183 = vmatpush1.bf16.msra.mxu1 %v3434_v55  ;;  %v3459_v55 = vld [vmem:[#allocation7 + $0x64] ss:$8 sps:$4 sm:$0xff]  }
 0x12a   :  { %3016 = vmatprep.subr.msk.bf16.mxu1 %vm922_vm1, %v3010_v57  ;;  %2071 = vmatpush1.bf16.msra.mxu0 %v3454_v53  ;;  %v3457_v57 = vld [vmem:[#allocation7 + $0x60] ss:$8 sps:$4 sm:$0xff]  }
 0x12b   :  { %2072 = vmatprep.subr.bf16.mxu0 %v3459_v55 }
 0x12d   :  { %1185 = vmatpush1.bf16.msra.mxu1 %v930_v59  ;;  %v3460_v59 = vld [vmem:[#allocation7 + $0x70] ss:$8 sps:$4 sm:$0xff]  }
 0x12e   :  { %2073 = vmatpush1.bf16.msra.mxu0 %v3457_v57 }
 0x12f   :  { %2074 = vmatprep.subr.bf16.mxu0 %v3462_v58 }
 0x130   :  { %1187 = vmatmul.mubr.bf16.vlgmr.msra.gmra.mrb[16].mxu1 %v3880_v18 }
 0x131   :  { %3018 = vmatprep.mubr.msk.bf16.mxu1 %vm909_vm0, %v3884_v22 }
 0x132   :  { %2075 = vmatpush1.bf16.msra.mxu0 %v3460_v59 }
 0x138   :  { %1197 = vmatmul.mubr.bf16.gmra.mrb[20].mxu1 %v3893_v34 }
 0x139   :  { %3019 = vmatprep.mubr.msk.bf16.mxu1 %vm909_vm0, %v3897_v38 }
 0x140   :  { %1207 = vmatmul.mubr.bf16.gmra.mrb[24].mxu1 %v3906_v50 }
 0x141   :  { %3020 = vmatprep.mubr.msk.bf16.mxu1 %vm909_vm0, %v3910_v56 }
 0x148   :  { %1217 = vmatmul.mubr.bf16.gmra.mrb[28].mxu1 %v3919_v0 }
 0x183   :  { %v969_v60 = vpop.f32.mrb[0].mxu1 }
 0x184   :  { %v1042_v61 = vpop.f32.mrb[0].mxu0  ;;  %v971_v18 = vpop.f32.mrb[1].mxu1 }
 0x185   :  { %v3945_v62 = vadd.f32 %v1042_v61, %v969_v60  ;;  %v1044_v63 = vpop.f32.mrb[1].mxu0  ;;  %v973_v22 = vpop.f32.mrb[2].mxu1  ;;  %v3465_v60 = vld [vmem:[#allocation7 + $0x84] ss:$8 sps:$4 sm:$0xff]   ;;  %v3463_v61 = vld [vmem:[#allocation7 + $0x80] ss:$8 sps:$4 sm:$0xff]  }
 0x186   :  { %v3947_v1 = vadd.f32 %v1044_v63, %v971_v18  ;;  %v1046_v34 = vpop.f32.mrb[2].mxu0  ;;  %v975_v38 = vpop.f32.mrb[3].mxu1  ;;  %2076 = vmatprep.subr.bf16.mxu0 %v3465_v60  ;;  %v3468_v18 = vld [vmem:[#allocation7 + $0x94] ss:$8 sps:$4 sm:$0xff]   ;;  %v3466_v63 = vld [vmem:[#allocation7 + $0x90] ss:$8 sps:$4 sm:$0xff]  }
 0x187   :  { %v3949_v2 = vadd.f32 %v1046_v34, %v973_v22  ;;  %v1048_v3 = vpop.f32.mrb[3].mxu0  ;;  %2077 = vmatpush1.bf16.msra.mxu0 %v3463_v61  ;;  %v3471_v22 = vld [vmem:[#allocation7 + $0xa4] ss:$8 sps:$4 sm:$0xff]   ;;  %v3469_v34 = vld [vmem:[#allocation7 + $0xa0] ss:$8 sps:$4 sm:$0xff]  }
 0x188   :  { %v3951_v50 = vadd.f32 %v1048_v3, %v975_v38  ;;  %2078 = vmatprep.subr.bf16.mxu0 %v3468_v18  ;;  %v3474_v38 = vld [vmem:[#allocation7 + $0xb4] ss:$8 sps:$4 sm:$0xff]   ;;  %v3472_v3 = vld [vmem:[#allocation7 + $0xb0] ss:$8 sps:$4 sm:$0xff]  }
 0x18b   :  { %v979_v4 = vpop.f32.mrb[4].mxu1  ;;  %2079 = vmatpush1.bf16.msra.mxu0 %v3466_v63 }
 0x18c   :  { %v1052_v56 = vpop.f32.mrb[4].mxu0  ;;  %v981_v0 = vpop.f32.mrb[5].mxu1  ;;  %2080 = vmatprep.subr.bf16.mxu0 %v3471_v22 }
 0x18d   :  { %v3953_v5 = vadd.f32 %v1052_v56, %v979_v4  ;;  %v1054_v6 = vpop.f32.mrb[5].mxu0  ;;  %v983_v8 = vpop.f32.mrb[6].mxu1  ;;  %v3477_v4 = vld [vmem:[#allocation7 + $0xc4] ss:$8 sps:$4 sm:$0xff]   ;;  %v3475_v56 = vld [vmem:[#allocation7 + $0xc0] ss:$8 sps:$4 sm:$0xff]  }
 0x18e   :  { %v3955_v7 = vadd.f32 %v1054_v6, %v981_v0  ;;  %v1056_v9 = vpop.f32.mrb[6].mxu0  ;;  %v985_v11 = vpop.f32.mrb[7].mxu1  ;;  %v3480_v0 = vld [vmem:[#allocation7 + $0xd4] ss:$8 sps:$4 sm:$0xff]   ;;  %v3478_v6 = vld [vmem:[#allocation7 + $0xd0] ss:$8 sps:$4 sm:$0xff]  }
 0x18f   :  { %v3957_v10 = vadd.f32 %v1056_v9, %v983_v8  ;;  %v1058_v12 = vpop.f32.mrb[7].mxu0  ;;  %2081 = vmatpush1.bf16.msra.mxu0 %v3469_v34  ;;  %v3483_v8 = vld [vmem:[#allocation7 + $0xe4] ss:$8 sps:$4 sm:$0xff]   ;;  %v3481_v9 = vld [vmem:[#allocation7 + $0xe0] ss:$8 sps:$4 sm:$0xff]  }
 0x190   :  { %v3959_v13 = vadd.f32 %v1058_v12, %v985_v11  ;;  %2082 = vmatprep.subr.bf16.mxu0 %v3474_v38  ;;  %v3486_v11 = vld [vmem:[#allocation7 + $0xf4] ss:$8 sps:$4 sm:$0xff]   ;;  %v3484_v12 = vld [vmem:[#allocation7 + $0xf0] ss:$8 sps:$4 sm:$0xff]  }
 0x192   :  { %v1299_v43 = vmul.f32 %v3959_v13, %v3959_v13 }
 0x193   :  { %v989_v51 = vpop.f32.mrb[8].mxu1  ;;  %2083 = vmatpush1.bf16.msra.mxu0 %v3472_v3 }
 0x194   :  { %v1062_v14 = vpop.f32.mrb[8].mxu0  ;;  %v991_v16 = vpop.f32.mrb[9].mxu1  ;;  %2084 = vmatprep.subr.bf16.mxu0 %v3477_v4 }
 0x195   :  { %v3961_v15 = vadd.f32 %v1062_v14, %v989_v51  ;;  %v1064_v19 = vpop.f32.mrb[9].mxu0  ;;  %v993_v23 = vpop.f32.mrb[10].mxu1  ;;  %v3489_v51 = vld [vmem:[#allocation7 + $0x104] ss:$8 sps:$4 sm:$0xff]   ;;  %v1286_v14 = vmul.f32 %v3945_v62, %v3945_v62 }
 0x196   :  { %v3963_v21 = vadd.f32 %v1064_v19, %v991_v16  ;;  %v1066_v24 = vpop.f32.mrb[10].mxu0  ;;  %v995_v26 = vpop.f32.mrb[11].mxu1  ;;  %v1230_v16 = vadd.f32 %v3949_v2, %v3945_v62  ;;  %v1290_v19 = vmul.f32 %v3949_v2, %v3949_v2 }
 0x197   :  { %v3965_v25 = vadd.f32 %v1066_v24, %v993_v23  ;;  %v1068_v27 = vpop.f32.mrb[11].mxu0  ;;  %2085 = vmatpush1.bf16.msra.mxu0 %v3475_v56  ;;  %v1243_v23 = vadd.f32 %v3951_v50, %v3947_v1  ;;  %v1291_v24 = vmul.f32 %v3951_v50, %v3951_v50  ;;  %v1302_v45 = vmul.f32 %v3961_v15, %v3961_v15 }
 0x198   :  { %v3967_v28 = vadd.f32 %v1068_v27, %v995_v26  ;;  %2086 = vmatprep.subr.bf16.mxu0 %v3480_v0  ;;  %v1231_v26 = vadd.f32 %v1230_v16, %v3953_v5  ;;  %v1294_v27 = vmul.f32 %v3953_v5, %v3953_v5  ;;  %v1303_v52 = vmul.f32 %v3963_v21, %v3963_v21 }
 0x199   :  { %v1306_v54 = vmul.f32 %v3965_v25, %v3965_v25 }
 0x19a   :  { %v1307_v58 = vmul.f32 %v3967_v28, %v3967_v28 }
 0x19b   :  { %v999_v29 = vpop.f32.mrb[12].mxu1  ;;  %2087 = vmatpush1.bf16.msra.mxu0 %v3478_v6 }
 0x19c   :  { %v1072_v30 = vpop.f32.mrb[12].mxu0  ;;  %v1001_v17 = vpop.f32.mrb[13].mxu1  ;;  %2088 = vmatprep.subr.bf16.mxu0 %v3483_v8 }
 0x19d   :  { %v3969_v31 = vadd.f32 %v1072_v30, %v999_v29  ;;  %v1074_v32 = vpop.f32.mrb[13].mxu0  ;;  %v1003_v35 = vpop.f32.mrb[14].mxu1  ;;  %v1244_v29 = vadd.f32 %v1243_v23, %v3955_v7  ;;  %v1287_v30 = vmul.f32 %v3947_v1, %v3947_v1 }
 0x19e   :  { %v3971_v20 = vadd.f32 %v1074_v32, %v1001_v17  ;;  %v1076_v33 = vpop.f32.mrb[14].mxu0  ;;  %v1005_v36 = vpop.f32.mrb[15].mxu1  ;;  %v1318_v17 = vadd.f32 %v1290_v19, %v1286_v14  ;;  %v1295_v32 = vmul.f32 %v3955_v7, %v3955_v7 }
 0x19f   :  { %v3973_v37 = vadd.f32 %v1076_v33, %v1003_v35  ;;  %v1078_v39 = vpop.f32.mrb[15].mxu0  ;;  %2089 = vmatpush1.bf16.msra.mxu0 %v3481_v9  ;;  %v1331_v35 = vadd.f32 %v1291_v24, %v1287_v30  ;;  %v1245_v41 = vadd.f32 %v1244_v29, %v3959_v13  ;;  %v1310_v60 = vmul.f32 %v3969_v31, %v3969_v31 }
 0x1a0   :  { %v3975_v40 = vadd.f32 %v1078_v39, %v1005_v36  ;;  %2090 = vmatprep.subr.bf16.mxu0 %v3486_v11  ;;  %v1319_v33 = vadd.f32 %v1318_v17, %v1294_v27  ;;  %v1232_v36 = vadd.f32 %v1231_v26, %v3957_v10  ;;  %v1298_v39 = vmul.f32 %v3957_v10, %v3957_v10 }
 0x1a1   :  { %4463 = vst [vmem:[#allocation19_spill] sm:$0xff] %v3973_v37  ;;  %v1332_v42 = vadd.f32 %v1331_v35, %v1295_v32  ;;  %v1246_v46 = vadd.f32 %v1245_v41, %v3963_v21  ;;  %v1311_v63 = vmul.f32 %v3971_v20, %v3971_v20  ;;  %v1314_v3 = vmul.f32 %v3973_v37, %v3973_v37 }
 0x1a2   :  { %v1233_v44 = vadd.f32 %v1232_v36, %v3961_v15  ;;  %v1320_v47 = vadd.f32 %v1319_v33, %v1298_v39  ;;  %v1315_v0 = vmul.f32 %v3975_v40, %v3975_v40 }
 0x1a3   :  { %2091 = vmatpush1.bf16.msra.mxu0 %v3484_v12  ;;  %v1333_v48 = vadd.f32 %v1332_v42, %v1299_v43  ;;  %v1247_v55 = vadd.f32 %v1246_v46, %v3967_v28 }
 0x1a4   :  { %2133 = vmatprep.subr.bf16.mxu0 %v3489_v51  ;;  %v1321_v49 = vadd.f32 %v1320_v47, %v1302_v45  ;;  %v1234_v53 = vadd.f32 %v1233_v44, %v3965_v25 }
 0x1a5   :  { %v1334_v57 = vadd.f32 %v1333_v48, %v1303_v52  ;;  %v1248_v61 = vadd.f32 %v1247_v55, %v3971_v20 }
 0x1a6   :  { %v1235_v59 = vadd.f32 %v1234_v53, %v3969_v31  ;;  %v1322_v18 = vadd.f32 %v1321_v49, %v1306_v54 }
 0x1a7   :  { %v1335_v22 = vadd.f32 %v1334_v57, %v1307_v58  ;;  %v1249_v4 = vadd.f32 %v1248_v61, %v3975_v40 }
 0x1a8   :  { %v1323_v34 = vadd.f32 %v1322_v18, %v1310_v60  ;;  %v1236_v38 = vadd.f32 %v1235_v59, %v3973_v37 }
 0x1a9   :  { %v1336_v56 = vadd.f32 %v1335_v22, %v1311_v63  ;;  %v1250_v51 = vrot.slane %v1249_v4, 4 }
 0x1aa   :  { %v1237_v9 = vrot.slane %v1236_v38, 4  ;;  %v1324_v11 = vadd.f32 %v1323_v34, %v1314_v3 }
 0x1ab   :  { %v1337_v24 = vadd.f32 %v1336_v56, %v1315_v0  ;;  %v1251_v33 = vadd.f32 %v1250_v51, %v1249_v4 }
 0x1ac   :  { %v1238_v17 = vadd.f32 %v1237_v9, %v1236_v38  ;;  %v1325_v32 = vrot.slane %v1324_v11, 4 }
 0x1ad   :  { %v1338_v36 = vrot.slane %v1337_v24, 4  ;;  %v1252_v48 = vrot.slane %v1251_v33, 2 }
 0x1ae   :  { %v1239_v44 = vrot.slane %v1238_v17, 2  ;;  %v1326_v45 = vadd.f32 %v1325_v32, %v1324_v11 }
 0x1af   :  { %v1339_v57 = vadd.f32 %v1338_v36, %v1337_v24  ;;  %v1253_v34 = vadd.f32 %v1252_v48, %v1251_v33 }
 0x1b0   :  { %v1240_v18 = vadd.f32 %v1239_v44, %v1238_v17  ;;  %v1327_v63 = vrot.slane %v1326_v45, 2 }
 0x1b1   :  { %v1340_v38 = vrot.slane %v1339_v57, 2 }
 0x1b2   :  { %v1241_v9 = vrot.slane %v1240_v18, 1  ;;  %v1328_v11 = vadd.f32 %v1327_v63, %v1326_v45 }
 0x1b4   :  { %v1242_v36 = vadd.f32 %v1241_v9, %v1240_v18 }
 0x203   :  { %v4025_v6 = vpop.f32.mrb[16].mxu1 }
 0x204   :  { %v4027_v8 = vpop.f32.mrb[17].mxu1  ;;  %v1288_v14 = vmul.f32 %v4025_v6, %v4025_v6 }
 0x205   :  { %v4029_v12 = vpop.f32.mrb[18].mxu1  ;;  %v1289_v26 = vmul.f32 %v4027_v8, %v4027_v8 }
 0x206   :  { %v1256_v16 = vadd.f32 %v4029_v12, %v4025_v6  ;;  %v1292_v19 = vmul.f32 %v4029_v12, %v4029_v12  ;;  %v4037_v23 = vpop.f32.mrb[19].mxu1 }
 0x207   :  { %v1269_v27 = vadd.f32 %v4037_v23, %v4027_v8  ;;  %v1293_v29 = vmul.f32 %v4037_v23, %v4037_v23 }
 0x208   :  { %v1344_v30 = vadd.f32 %v1292_v19, %v1288_v14  ;;  %v1254_v19 = vrot.slane %v1253_v34, 1 }
 0x209   :  { %v1357_v35 = vadd.f32 %v1293_v29, %v1289_v26 }
 0x20a   :  { %v1255_v44 = vadd.f32 %v1254_v19, %v1253_v34 }
 0x20b   :  { %v4045_v39 = vpop.f32.mrb[20].mxu1 }
 0x20c   :  { %v1257_v41 = vadd.f32 %v1256_v16, %v4045_v39  ;;  %v1296_v42 = vmul.f32 %v4045_v39, %v4045_v39  ;;  %v4050_v43 = vpop.f32.mrb[21].mxu1 }
 0x20d   :  { %v1270_v46 = vadd.f32 %v1269_v27, %v4050_v43  ;;  %v1297_v47 = vmul.f32 %v4050_v43, %v4050_v43  ;;  %v4055_v52 = vpop.f32.mrb[22].mxu1 }
 0x20e   :  { %v1345_v49 = vadd.f32 %v1344_v30, %v1296_v42  ;;  %v1258_v53 = vadd.f32 %v1257_v41, %v4055_v52  ;;  %v1300_v54 = vmul.f32 %v4055_v52, %v4055_v52  ;;  %v4060_v55 = vpop.f32.mrb[23].mxu1  ;;  %v1341_v30 = vadd.f32 %v1340_v38, %v1339_v57 }
 0x20f   :  { %v1358_v58 = vadd.f32 %v1357_v35, %v1297_v47  ;;  %v1271_v59 = vadd.f32 %v1270_v46, %v4060_v55  ;;  %v1301_v60 = vmul.f32 %v4060_v55, %v4060_v55  ;;  %v1329_v41 = vrot.slane %v1328_v11, 1 }
 0x210   :  { %v1346_v61 = vadd.f32 %v1345_v49, %v1300_v54  ;;  %v1342_v45 = vrot.slane %v1341_v30, 1 }
 0x211   :  { %v1359_v22 = vadd.f32 %v1358_v58, %v1301_v60  ;;  %v1330_v54 = vadd.f32 %v1329_v41, %v1328_v11  ;;  %v4099_v60 = vmul.f32 0.015625, %v1255_v44 }
 0x212   :  { %v1343_v34 = vadd.f32 %v1342_v45, %v1341_v30 }
 0x213   :  { %v4065_v3 = vpop.f32.mrb[24].mxu1  ;;  %v1370_v19 = vmul.f32 0.015625, %v1330_v54  ;;  %v1375_v30 = vmul.f32 %v4099_v60, %v4099_v60 }
 0x214   :  { %v1259_v4 = vadd.f32 %v1258_v53, %v4065_v3  ;;  %v1304_v56 = vmul.f32 %v4065_v3, %v4065_v3  ;;  %v4070_v0 = vpop.f32.mrb[25].mxu1  ;;  %v4092_v53 = vmul.f32 0.015625, %v1242_v36 }
 0x215   :  { %v1272_v51 = vadd.f32 %v1271_v59, %v4070_v0  ;;  %v1305_v14 = vmul.f32 %v4070_v0, %v4070_v0  ;;  %v4075_v16 = vpop.f32.mrb[26].mxu1 }
 0x216   :  { %v1347_v24 = vadd.f32 %v1346_v61, %v1304_v56  ;;  %v1260_v26 = vadd.f32 %v1259_v4, %v4075_v16  ;;  %v1308_v27 = vmul.f32 %v4075_v16, %v4075_v16  ;;  %v4080_v29 = vpop.f32.mrb[27].mxu1 }
 0x217   :  { %v1360_v17 = vadd.f32 %v1359_v22, %v1305_v14  ;;  %v1273_v32 = vadd.f32 %v1272_v51, %v4080_v29  ;;  %v1309_v35 = vmul.f32 %v4080_v29, %v4080_v29 }
 0x218   :  { %v1348_v33 = vadd.f32 %v1347_v24, %v1308_v27  ;;  %v1374_v24 = vmul.f32 %v4092_v53, %v4092_v53 }
 0x219   :  { %v1361_v42 = vadd.f32 %v1360_v17, %v1309_v35  ;;  %v1371_v17 = vmul.f32 0.015625, %v1343_v34 }
 0x21a   :  { %v1378_v44 = vsub.f32 %v1370_v19, %v1374_v24 }
 0x21b   :  { %v4085_v46 = vpop.f32.mrb[28].mxu1 }
 0x21c   :  { %v1261_v47 = vadd.f32 %v1260_v26, %v4085_v46  ;;  %v1312_v48 = vmul.f32 %v4085_v46, %v4085_v46  ;;  %v4090_v49 = vpop.f32.mrb[29].mxu1  ;;  %v1382_v34 = vmax.f32 %v1378_v44, 0.0 }
 0x21d   :  { %v1274_v57 = vadd.f32 %v1273_v32, %v4090_v49  ;;  %v1313_v58 = vmul.f32 %v4090_v49, %v4090_v49  ;;  %v4097_v59 = vpop.f32.mrb[30].mxu1 }
 0x21e   :  { %v1349_v61 = vadd.f32 %v1348_v33, %v1312_v48  ;;  %v1262_v18 = vadd.f32 %v1261_v47, %v4097_v59  ;;  %v1316_v63 = vmul.f32 %v4097_v59, %v4097_v59  ;;  %v4104_v22 = vpop.f32.mrb[31].mxu1  ;;  %v1379_v48 = vsub.f32 %v1371_v17, %v1375_v30 }
 0x21f   :  { %v1362_v38 = vadd.f32 %v1361_v42, %v1313_v58  ;;  %v1275_v4 = vadd.f32 %v1274_v57, %v4104_v22  ;;  %v1317_v56 = vmul.f32 %v4104_v22, %v4104_v22  ;;  %v1386_v19 = vadd.f32 1e-05, %v1382_v34 }
 0x220   :  { %v1263_v9 = vrot.slane %v1262_v18, 4  ;;  %v1350_v11 = vadd.f32 %v1349_v61, %v1316_v63 }
 0x221   :  { %v1276_v51 = vrot.slane %v1275_v4, 4  ;;  %v1363_v14 = vadd.f32 %v1362_v38, %v1317_v56  ;;  %3559 = vrsqrt.f32 %v1386_v19 }
 0x222   :  { %v1264_v26 = vadd.f32 %v1263_v9, %v1262_v18  ;;  %v1351_v27 = vrot.slane %v1350_v11, 4  ;;  %v1383_v9 = vmax.f32 %v1379_v48, 0.0  ;;  %v1403_v48 = vlaneseq }
 0x223   :  { %v1277_v32 = vadd.f32 %v1276_v51, %v1275_v4  ;;  %v1364_v35 = vrot.slane %v1363_v14, 4 }
 0x224   :  { %v1265_v33 = vrot.slane %v1264_v26, 2  ;;  %v1352_v36 = vadd.f32 %v1351_v27, %v1350_v11  ;;  %v1387_v17 = vadd.f32 1e-05, %v1383_v9 }
 0x225   :  { %v1278_v41 = vrot.slane %v1277_v32, 2  ;;  %v1365_v42 = vadd.f32 %v1364_v35, %v1363_v14 }
 0x226   :  { %v1266_v45 = vadd.f32 %v1265_v33, %v1264_v26  ;;  %v1353_v47 = vrot.slane %v1352_v36, 2  ;;  %3561 = vrsqrt.f32 %v1387_v17 }
 0x227   :  { %v1279_v54 = vadd.f32 %v1278_v41, %v1277_v32  ;;  %v1366_v57 = vrot.slane %v1365_v42, 2 }
 0x228   :  { %v1267_v58 = vrot.slane %v1266_v45, 1  ;;  %v1354_v61 = vadd.f32 %v1353_v47, %v1352_v36 }
 0x229   :  { %v1280_v18 = vrot.slane %v1279_v54, 1  ;;  %v1367_v63 = vadd.f32 %v1366_v57, %v1365_v42 }
 0x22a   :  { %v1268_v38 = vadd.f32 %v1267_v58, %v1266_v45  ;;  %v1355_v56 = vrot.slane %v1354_v61, 1  ;;  %v3751_v45 = vmov 1966171168   ;;  %v4113_v58 = vshrl.u32 %v1403_v48, 7 }
 0x22b   :  { %v1281_v4 = vadd.f32 %v1280_v18, %v1279_v54  ;;  %v1368_v51 = vrot.slane %v1367_v63, 1  ;;  %v1401_v47 = vunpack.c.l.s4 %v3751_v45  ;;  %v3560_v54 = vpop.eup %3559 }
 0x22c   :  { %v1284_v37 = vmul.f32 0.015625, %v1268_v38  ;;  %v1356_v11 = vadd.f32 %v1355_v56, %v1354_v61  ;;  %v1439_v17 = vsub.s32 3, %v4113_v58 }
 0x22d   :  { %v1285_v27 = vmul.f32 0.015625, %v1281_v4  ;;  %v1369_v14 = vadd.f32 %v1368_v51, %v1367_v63  ;;  %v1402_v57 = vunpack.c.0.s8 %v1401_v47 }
 0x22e   :  { %v1372_v24 = vmul.f32 0.015625, %v1356_v11  ;;  %v1376_v26 = vmul.f32 %v1284_v37, %v1284_v37  ;;  %v1227_v11 = vld [vmem:[#allocation11] ss:$8 sm:$0xf] }
 0x22f   :  { %v1373_v30 = vmul.f32 0.015625, %v1369_v14  ;;  %v1377_v32 = vmul.f32 %v1285_v27, %v1285_v27  ;;  %v4116_v34 = vsub.s32 %v1402_v57, %v4113_v58  ;;  %v4121_v14 = vsub.s32 0, %v4113_v58 }
 0x230   :  { %v1380_v35 = vsub.f32 %v1372_v24, %v1376_v26  ;;  %v3562_v61 = vpop.eup %3561  ;;  %v4125_v24 = vsub.s32 1, %v4113_v58  ;;  %v1435_v26 = vsub.s32 2, %v4113_v58 }
 0x231   :  { %v1381_v33 = vsub.f32 %v1373_v30, %v1377_v32  ;;  %v1398_v63 = vcombine.low %v3560_v54, %v3562_v61 }
 0x232   :  { %v1384_v36 = vmax.f32 %v1380_v35, 0.0 }
 0x233   :  { %v1385_v41 = vmax.f32 %v1381_v33, 0.0  ;;  %v1406_v9 = vrot.slane %v1398_v63, %v4116_v34 }
 0x234   :  { %v1388_v42 = vadd.f32 1e-05, %v1384_v36 }
 0x235   :  { %v1389_v44 = vadd.f32 1e-05, %v1385_v41 }
 0x236   :  { %3563 = vrsqrt.f32 %v1388_v42 }
 0x237   :  { %3565 = vrsqrt.f32 %v1389_v44 }
 0x240   :  { %v3564_v18 = vpop.eup %3563 }
 0x241   :  { %v3566_v38 = vpop.eup %3565 }
 0x242   :  { %v1399_v56 = vcombine.low %v3564_v18, %v3566_v38 }
 0x244   :  { %v1413_v4 = vrot.slane %v1399_v56, %v4116_v34 }
 0x246   :  { %v1414_v51 = vcombine.low %v1406_v9, %v1413_v4 }
 0x248   :  { %v1421_v19 = vrot.slane %v1414_v51, %v4116_v34 }
 0x24a   :  { %v1423_v30 = vmul.f32 %v1421_v19, %v1227_v11 }
 0x24c   :  { %v1428_v32 = vrot.slane %v1423_v30, %v4121_v14  ;;  %v1432_v35 = vrot.slane %v1423_v30, %v4125_v24  ;;  %v1436_v33 = vrot.slane %v1423_v30, %v1435_v26  ;;  %v1440_v36 = vrot.slane %v1423_v30, %v1439_v17 }
 0x24e   :  { %v1445_v41 = vmul.f32 %v1428_v32, %v4092_v53  ;;  %v1446_v42 = vmul.f32 %v1432_v35, %v4099_v60  ;;  %v1447_v44 = vmul.f32 %v1436_v33, %v1284_v37  ;;  %v1448_v45 = vmul.f32 %v1440_v36, %v1285_v27 }
 0x24f   :  { %v1510_v47 = vmul.f32 %v1440_v36, %v4104_v22  ;;  %v1480_v61 = vmul.f32 %v1432_v35, %v3947_v1  ;;  %v1484_v18 = vmul.f32 %v1432_v35, %v3951_v50  ;;  %v1479_v63 = vmul.f32 %v1428_v32, %v3945_v62  ;;  %v1229_v1 = vld [vmem:[#allocation11 + $0x1] ss:$8 sm:$0xf] }
 0x250   :  { %v1453_v48 = vcombine.low %v1445_v41, %v1446_v42  ;;  %v1454_v54 = vcombine.low %v1447_v44, %v1448_v45  ;;  %v1483_v53 = vmul.f32 %v1428_v32, %v3949_v2  ;;  %v1488_v60 = vmul.f32 %v1432_v35, %v3955_v7  ;;  %v3487_v45 = vld [vmem:[#allocation7 + $0x100] ss:$8 sps:$4 sm:$0xff]  }
 0x251   :  { %v1492_v37 = vmul.f32 %v1432_v35, %v3959_v13  ;;  %v1487_v22 = vmul.f32 %v1428_v32, %v3953_v5  ;;  %v4144_v38 = vmul.f32 %v1440_v36, %v4027_v8  ;;  %v4147_v56 = vmul.f32 %v1440_v36, %v4037_v23 }
 0x252   :  { %v1461_v57 = vrot.slane %v1453_v48, %v4116_v34  ;;  %v1468_v58 = vrot.slane %v1454_v54, %v4116_v34  ;;  %v4150_v50 = vmul.f32 %v1436_v33, %v4025_v6  ;;  %v4153_v62 = vmul.f32 %v1436_v33, %v4029_v12 }
 0x253   :  { %v4156_v2 = vmul.f32 %v1440_v36, %v4050_v43  ;;  %v4159_v7 = vmul.f32 %v1440_v36, %v4060_v55  ;;  %v4163_v13 = vmul.f32 %v1436_v33, %v4045_v39  ;;  %v4166_v8 = vmul.f32 %v1436_v33, %v4055_v52 }
 0x254   :  { %v1469_v27 = vcombine.low %v1461_v57, %v1468_v58  ;;  %v4169_v6 = vmul.f32 %v1440_v36, %v4070_v0  ;;  %v4172_v12 = vmul.f32 %v1440_v36, %v4080_v29  ;;  %v4175_v23 = vmul.f32 %v1436_v33, %v4065_v3 }
 0x255   :  { %v4178_v43 = vmul.f32 %v1436_v33, %v4075_v16  ;;  %v4181_v55 = vmul.f32 %v1440_v36, %v4090_v49  ;;  %v1491_v9 = vmul.f32 %v1428_v32, %v3957_v10  ;;  %v4185_v52 = vmul.f32 %v1436_v33, %v4085_v46 }
 0x256   :  { %v1476_v5 = vrot.slane %v1469_v27, %v4116_v34  ;;  %v4188_v0 = vmul.f32 %v1436_v33, %v4097_v59  ;;  %v1496_v29 = vmul.f32 %v1432_v35, %v3963_v21  ;;  %v1500_v3 = vmul.f32 %v1432_v35, %v3967_v28 }
 0x257   :  { %v1495_v4 = vmul.f32 %v1428_v32, %v3961_v15  ;;  %v1499_v16 = vmul.f32 %v1428_v32, %v3965_v25  ;;  %v1504_v59 = vmul.f32 %v1432_v35, %v3971_v20  ;;  %v4206_v21 = vmul.f32 %v1432_v35, %v3975_v40  ;;  %v4464_v15 = vld [vmem:[#allocation19_spill] sm:$0xff] }
 0x258   :  { %v1478_v39 = vsub.f32 %v1229_v1, %v1476_v5  ;;  %v4209_v28 = vmul.f32 %v1428_v32, %v3969_v31  ;;  %v4212_v25 = vmul.f32 %v1428_v32, %v4464_v15 }
 0x25a   :  { %v4195_v49 = vrot.slane %v1478_v39, %v4121_v14  ;;  %v4198_v51 = vrot.slane %v1478_v39, %v4125_v24  ;;  %v4200_v10 = vrot.slane %v1478_v39, %v1435_v26  ;;  %v4202_v46 = vrot.slane %v1478_v39, %v1439_v17  ;;  %v3490_v39 = vld [vmem:[#allocation7 + $0x110] ss:$8 sps:$4 sm:$0xff]  }
 0x25c   :  { %v4215_v11 = vadd.f32 %v4202_v46, %v1510_v47  ;;  %v1533_v19 = vadd.f32 %v4198_v51, %v1480_v61  ;;  %v1537_v26 = vadd.f32 %v4198_v51, %v1484_v18  ;;  %v1532_v17 = vadd.f32 %v4195_v49, %v1479_v63  ;;  %v3492_v61 = vld [vmem:[#allocation7 + $0x114] ss:$8 sps:$4 sm:$0xff]  }
 0x25d   :  { %v1536_v20 = vadd.f32 %v4195_v49, %v1483_v53  ;;  %v1541_v40 = vadd.f32 %v4198_v51, %v1488_v60  ;;  %v1545_v30 = vadd.f32 %v4198_v51, %v1492_v37  ;;  %v1540_v31 = vadd.f32 %v4195_v49, %v1487_v22 }
 0x25e   :  { %vm1565_vm2 = vcmp.ge.f32.partialorder %v1533_v19, 0.0  ;;  %vm1569_vm3 = vcmp.ge.f32.partialorder %v1537_v26, 0.0  ;;  %v1597_v32 = vmul.f32 0.2, %v1533_v19  ;;  %v1601_v35 = vmul.f32 0.2, %v1537_v26 }
 0x25f   :  { %vm1564_vm4 = vcmp.ge.f32.partialorder %v1532_v17, 0.0  ;;  %vm1568_vm5 = vcmp.ge.f32.partialorder %v1536_v20, 0.0  ;;  %v1596_v33 = vmul.f32 0.2, %v1532_v17  ;;  %v1600_v36 = vmul.f32 0.2, %v1536_v20 }
 0x260   :  { %v1629_v41 = vsel %vm1565_vm2, %v1533_v19, %v1597_v32  ;;  %v1633_v42 = vsel %vm1569_vm3, %v1537_v26, %v1601_v35  ;;  %vm1573_vm6 = vcmp.ge.f32.partialorder %v1541_v40, 0.0  ;;  %vm1577_vm7 = vcmp.ge.f32.partialorder %v1545_v30, 0.0 }
 0x261   :  { %v1661_v44 = vpack.c.bf16 %v1633_v42, %v1629_v41  ;;  %v1628_v47 = vsel %vm1564_vm4, %v1532_v17, %v1596_v33  ;;  %v1632_v48 = vsel %vm1568_vm5, %v1536_v20, %v1600_v36  ;;  %v1605_v54 = vmul.f32 0.2, %v1541_v40 }
 0x262   :  { %v1660_v57 = vpack.c.bf16 %v1632_v48, %v1628_v47  ;;  %v1609_v58 = vmul.f32 0.2, %v1545_v30  ;;  %v1544_v18 = vadd.f32 %v4195_v49, %v1491_v9  ;;  %vm1572_vm8 = vcmp.ge.f32.partialorder %v1540_v31, 0.0  ;;  %v3495_v9 = vld [vmem:[#allocation7 + $0x124] ss:$8 sps:$4 sm:$0xff]  }
 0x263   :  { %2092 = vmatprep.mubr.bf16.mxu0 %v1661_v44  ;;  %v1637_v63 = vsel %vm1573_vm6, %v1541_v40, %v1605_v54  ;;  %v1604_v53 = vmul.f32 0.2, %v1540_v31  ;;  %v1549_v60 = vadd.f32 %v4198_v51, %v1496_v29  ;;  %v1553_v37 = vadd.f32 %v4198_v51, %v1500_v3 }
 0x264   :  { %2093 = vmatmul.mubr.bf16.vlgmr.msra.gmra.mrb[16].mxu0 %v1660_v57  ;;  %v1641_v27 = vsel %vm1577_vm7, %v1545_v30, %v1609_v58  ;;  %vm1576_vm9 = vcmp.ge.f32.partialorder %v1544_v18, 0.0  ;;  %v1608_v22 = vmul.f32 0.2, %v1544_v18  ;;  %v1548_v1 = vadd.f32 %v4195_v49, %v1495_v4 }
 0x265   :  { %2134 = vmatpush1.bf16.msra.mxu0 %v3487_v45  ;;  %v1665_v5 = vpack.c.bf16 %v1641_v27, %v1637_v63  ;;  %v1636_v15 = vsel %vm1572_vm8, %v1540_v31, %v1604_v53  ;;  %vm1581_vm10 = vcmp.ge.f32.partialorder %v1549_v60, 0.0  ;;  %vm1585_vm11 = vcmp.ge.f32.partialorder %v1553_v37, 0.0  ;;  %v3493_v31 = vld [vmem:[#allocation7 + $0x120] ss:$8 sps:$4 sm:$0xff]  }
 0x266   :  { %2135 = vmatprep.subr.bf16.mxu0 %v3492_v61  ;;  %v1640_v19 = vsel %vm1576_vm9, %v1544_v18, %v1608_v22  ;;  %v1613_v26 = vmul.f32 0.2, %v1549_v60  ;;  %v1617_v29 = vmul.f32 0.2, %v1553_v37  ;;  %v1552_v3 = vadd.f32 %v4195_v49, %v1499_v16  ;;  %v3498_v16 = vld [vmem:[#allocation7 + $0x134] ss:$8 sps:$4 sm:$0xff]  }
 0x267   :  { %2102 = vmatprep.mubr.bf16.mxu0 %v1665_v5  ;;  %v1664_v17 = vpack.c.bf16 %v1640_v19, %v1636_v15  ;;  %vm1580_vm12 = vcmp.ge.f32.partialorder %v1548_v1, 0.0  ;;  %v1612_v20 = vmul.f32 0.2, %v1548_v1  ;;  %v1557_v40 = vadd.f32 %v4198_v51, %v1504_v59  ;;  %v3499_v22 = vld [vmem:[#allocation7 + $0x140] ss:$8 sps:$4 sm:$0xff]  }
 0x268   :  { %v1645_v4 = vsel %vm1581_vm10, %v1549_v60, %v1613_v26  ;;  %v1649_v30 = vsel %vm1585_vm11, %v1553_v37, %v1617_v29  ;;  %vm1584_vm13 = vcmp.ge.f32.partialorder %v1552_v3, 0.0  ;;  %v1616_v32 = vmul.f32 0.2, %v1552_v3 }
 0x269   :  { %2136 = vmatpush1.bf16.msra.mxu0 %v3490_v39  ;;  %v1669_v35 = vpack.c.bf16 %v1649_v30, %v1645_v4  ;;  %v1644_v33 = vsel %vm1580_vm12, %v1548_v1, %v1612_v20  ;;  %v1561_v36 = vadd.f32 %v4198_v51, %v4206_v21  ;;  %vm1589_vm14 = vcmp.ge.f32.partialorder %v1557_v40, 0.0  ;;  %v3496_v21 = vld [vmem:[#allocation7 + $0x130] ss:$8 sps:$4 sm:$0xff]   ;;  %v3504_v39 = vld [vmem:[#allocation7 + $0x154] ss:$8 sps:$4 sm:$0xff]  }
 0x26a   :  { %2137 = vmatprep.subr.bf16.mxu0 %v3495_v9  ;;  %v1648_v41 = vsel %vm1584_vm13, %v1552_v3, %v1616_v32  ;;  %v1621_v42 = vmul.f32 0.2, %v1557_v40  ;;  %v1556_v44 = vadd.f32 %v4195_v49, %v4209_v28  ;;  %v1560_v59 = vadd.f32 %v4195_v49, %v4212_v25  ;;  %v3501_v49 = vld [vmem:[#allocation7 + $0x144] ss:$8 sps:$4 sm:$0xff]  }
 0x26b   :  { %v1668_v45 = vpack.c.bf16 %v1648_v41, %v1644_v33  ;;  %vm1593_vm15 = vcmp.ge.f32.partialorder %v1561_v36, 0.0  ;;  %v1625_v47 = vmul.f32 0.2, %v1561_v36  ;;  %v1535_v48 = vadd.f32 %v4202_v46, %v4144_v38  ;;  %v3507_v4 = vld [vmem:[#allocation7 + $0x164] ss:$8 sps:$4 sm:$0xff]  }
 0x26c   :  { %2103 = vmatmul.mubr.bf16.gmra.mrb[20].mxu0 %v1664_v17  ;;  %v1653_v54 = vsel %vm1589_vm14, %v1557_v40, %v1621_v42  ;;  %vm1588_vm0 = vcmp.ge.f32.partialorder %v1556_v44, 0.0  ;;  %vm1592_vm1 = vcmp.ge.f32.partialorder %v1560_v59, 0.0  ;;  %v1620_v51 = vmul.f32 0.2, %v1556_v44  ;;  %v3505_v41 = vld [vmem:[#allocation7 + $0x160] ss:$8 sps:$4 sm:$0xff]  }
 0x26d   :  { %2138 = vmatpush1.bf16.msra.mxu0 %v3493_v31  ;;  %2112 = vmatprep.mubr.bf16.mxu0 %v1669_v35  ;;  %v1657_v57 = vsel %vm1593_vm15, %v1561_v36, %v1625_v47  ;;  %v1624_v58 = vmul.f32 0.2, %v1560_v59  ;;  %v1539_v28 = vadd.f32 %v4202_v46, %v4147_v56  ;;  %vm1567_vm2 = vcmp.ge.f32.partialorder %v1535_v48, 0.0 }
 0x26e   :  { %2139 = vmatprep.subr.bf16.mxu0 %v3498_v16  ;;  %v1673_v25 = vpack.c.bf16 %v1657_v57, %v1653_v54  ;;  %v4241_v61 = vsel %vm1588_vm0, %v1556_v44, %v1620_v51  ;;  %v1599_v38 = vmul.f32 0.2, %v1535_v48  ;;  %v1534_v18 = vadd.f32 %v4200_v10, %v4150_v50  ;;  %v3510_v44 = vld [vmem:[#allocation7 + $0x174] ss:$8 sps:$4 sm:$0xff]  }
 0x26f   :  { %v4245_v63 = vsel %vm1592_vm1, %v1560_v59, %v1624_v58  ;;  %vm1571_vm3 = vcmp.ge.f32.partialorder %v1539_v28, 0.0  ;;  %v1603_v53 = vmul.f32 0.2, %v1539_v28  ;;  %v1538_v60 = vadd.f32 %v4200_v10, %v4153_v62 }
 0x270   :  { %v1672_v56 = vpack.c.bf16 %v4245_v63, %v4241_v61  ;;  %v4251_v37 = vsel %vm1567_vm2, %v1535_v48, %v1599_v38  ;;  %vm1566_vm4 = vcmp.ge.f32.partialorder %v1534_v18, 0.0  ;;  %v1598_v27 = vmul.f32 0.2, %v1534_v18 }
 0x271   :  { %2140 = vmatpush1.bf16.msra.mxu0 %v3496_v21  ;;  %v1635_v1 = vsel %vm1571_vm3, %v1539_v28, %v1603_v53  ;;  %vm1570_vm5 = vcmp.ge.f32.partialorder %v1538_v60, 0.0  ;;  %v1602_v5 = vmul.f32 0.2, %v1538_v60  ;;  %v1543_v50 = vadd.f32 %v4202_v46, %v4156_v2  ;;  %v3502_v2 = vld [vmem:[#allocation7 + $0x150] ss:$8 sps:$4 sm:$0xff]  }
 0x272   :  { %2141 = vmatprep.subr.bf16.mxu0 %v3501_v49  ;;  %v1663_v15 = vpack.c.bf16 %v1635_v1, %v4251_v37  ;;  %v4256_v62 = vsel %vm1566_vm4, %v1534_v18, %v1598_v27  ;;  %v1547_v9 = vadd.f32 %v4202_v46, %v4159_v7  ;;  %v1542_v19 = vadd.f32 %v4200_v10, %v4163_v13  ;;  %v3508_v28 = vld [vmem:[#allocation7 + $0x170] ss:$8 sps:$4 sm:$0xff]   ;;  %v3511_v53 = vld [vmem:[#allocation7 + $0x180] ss:$8 sps:$4 sm:$0xff]   ;;  %v3519_v27 = vld [vmem:[#allocation7 + $0x1a4] ss:$8 sps:$4 sm:$0xff]  }
 0x273   :  { %v4262_v26 = vsel %vm1570_vm5, %v1538_v60, %v1602_v5  ;;  %vm1575_vm6 = vcmp.ge.f32.partialorder %v1543_v50, 0.0  ;;  %v1607_v29 = vmul.f32 0.2, %v1543_v50  ;;  %v1546_v3 = vadd.f32 %v4200_v10, %v4166_v8  ;;  %v3525_v1 = vld [vmem:[#allocation7 + $0x1c4] ss:$8 sps:$4 sm:$0xff]  }
 0x274   :  { %2113 = vmatmul.mubr.bf16.gmra.mrb[24].mxu0 %v1668_v45  ;;  %v1662_v17 = vpack.c.bf16 %v4262_v26, %v4256_v62  ;;  %vm1579_vm7 = vcmp.ge.f32.partialorder %v1547_v9, 0.0  ;;  %v1611_v20 = vmul.f32 0.2, %v1547_v9  ;;  %vm1574_vm8 = vcmp.ge.f32.partialorder %v1542_v19, 0.0  ;;  %v3523_v5 = vld [vmem:[#allocation7 + $0x1c0] ss:$8 sps:$4 sm:$0xff]  }
 0x275   :  { %2142 = vmatpush1.bf16.msra.mxu0 %v3499_v22  ;;  %2122 = vmatprep.mubr.bf16.mxu0 %v1673_v25  ;;  %v4268_v7 = vsel %vm1575_vm6, %v1543_v50, %v1607_v29  ;;  %vm1578_vm9 = vcmp.ge.f32.partialorder %v1546_v3, 0.0  ;;  %v1606_v13 = vmul.f32 0.2, %v1542_v19  ;;  %v1610_v40 = vmul.f32 0.2, %v1546_v3  ;;  %v3539_v62 = vld [vmem:[#allocation8 + $0x50] sm:$0xff]  }
 0x276   :  { %2143 = vmatprep.subr.bf16.mxu0 %v3504_v39  ;;  %v4270_v30 = vsel %vm1579_vm7, %v1547_v9, %v1611_v20  ;;  %v1551_v8 = vadd.f32 %v4202_v46, %v4169_v6  ;;  %v1555_v32 = vadd.f32 %v4202_v46, %v4172_v12  ;;  %v1550_v31 = vadd.f32 %v4200_v10, %v4175_v23  ;;  %v3513_v25 = vld [vmem:[#allocation7 + $0x184] ss:$8 sps:$4 sm:$0xff]   ;;  %v3520_v22 = vld [vmem:[#allocation7 + $0x1b0] ss:$8 sps:$4 sm:$0xff]   ;;  %v3528_v50 = vld [vmem:[#allocation7 + $0x1d4] ss:$8 sps:$4 sm:$0xff]  }
 0x277   :  { %v1667_v35 = vpack.c.bf16 %v4270_v30, %v4268_v7  ;;  %v4280_v33 = vsel %vm1574_vm8, %v1542_v19, %v1606_v13  ;;  %v4282_v36 = vsel %vm1578_vm9, %v1546_v3, %v1610_v40  ;;  %v1554_v16 = vadd.f32 %v4200_v10, %v4178_v43  ;;  %v3526_v39 = vld [vmem:[#allocation7 + $0x1d0] ss:$8 sps:$4 sm:$0xff]   ;;  %v3529_v9 = vld [vmem:[#allocation7 + $0x1e0] ss:$8 sps:$4 sm:$0xff]   ;;  %v3534_v19 = vld [vmem:[#allocation7 + $0x1f4] ss:$8 sps:$4 sm:$0xff]  }
 0x278   :  { %v1666_v6 = vpack.c.bf16 %v4282_v36, %v4280_v33  ;;  %vm1583_vm10 = vcmp.ge.f32.partialorder %v1551_v8, 0.0  ;;  %vm1587_vm11 = vcmp.ge.f32.partialorder %v1555_v32, 0.0  ;;  %v1615_v12 = vmul.f32 0.2, %v1551_v8  ;;  %v3532_v29 = vld [vmem:[#allocation7 + $0x1f0] ss:$8 sps:$4 sm:$0xff]  }
 0x279   :  { %2144 = vmatpush1.bf16.msra.mxu0 %v3502_v2  ;;  %v1619_v42 = vmul.f32 0.2, %v1555_v32  ;;  %vm1582_vm12 = vcmp.ge.f32.partialorder %v1550_v31, 0.0  ;;  %vm1586_vm13 = vcmp.ge.f32.partialorder %v1554_v16, 0.0  ;;  %v1614_v23 = vmul.f32 0.2, %v1550_v31 }
 0x27a   :  { %2145 = vmatprep.subr.bf16.mxu0 %v3507_v4  ;;  %v4288_v59 = vsel %vm1583_vm10, %v1551_v8, %v1615_v12  ;;  %v1618_v45 = vmul.f32 0.2, %v1554_v16  ;;  %v1559_v43 = vadd.f32 %v4202_v46, %v4181_v55  ;;  %vm1595_vm14 = vcmp.ge.f32.partialorder %v4215_v11, 0.0  ;;  %v3535_v3 = vld [vmem:[#allocation8 + $0x40] sm:$0xff]   ;;  %v3537_v20 = vld [vmem:[#allocation8 + $0x48] sm:$0xff]   ;;  %v3540_v26 = vld [vmem:[#allocation8 + $0x10] sm:$0xff]  }
 0x27b   :  { %v1651_v47 = vsel %vm1587_vm11, %v1555_v32, %v1619_v42  ;;  %v1646_v48 = vsel %vm1582_vm12, %v1550_v31, %v1614_v23  ;;  %v1627_v54 = vmul.f32 0.2, %v4215_v11  ;;  %v1558_v51 = vadd.f32 %v4200_v10, %v4185_v52  ;;  %v3536_v2 = vld [vmem:[#allocation8] sm:$0xff]   ;;  %v3538_v13 = vld [vmem:[#allocation8 + $0x8] sm:$0xff]   ;;  %v3542_v7 = vld [vmem:[#allocation8 + $0x18] sm:$0xff]  }
 0x27c   :  { %2123 = vmatmul.mubr.bf16.gmra.mrb[28].mxu0 %v1672_v56  ;;  %v1671_v21 = vpack.c.bf16 %v1651_v47, %v4288_v59  ;;  %v1650_v57 = vsel %vm1586_vm13, %v1554_v16, %v1618_v45  ;;  %vm1591_vm15 = vcmp.ge.f32.partialorder %v1559_v43, 0.0  ;;  %v1623_v58 = vmul.f32 0.2, %v1559_v43  ;;  %v3516_v56 = vld [vmem:[#allocation7 + $0x194] ss:$8 sps:$4 sm:$0xff]   ;;  %v3543_v40 = vld [vmem:[#allocation8 + $0x60] sm:$0xff]  }
 0x27d   :  { %2146 = vmatpush1.bf16.msra.mxu0 %v3505_v41  ;;  %2165 = vmatprep.mubr.bf16.mxu0 %v1663_v15  ;;  %v1670_v49 = vpack.c.bf16 %v1650_v57, %v1646_v48  ;;  %v1659_v55 = vsel %vm1595_vm14, %v4215_v11, %v1627_v54  ;;  %v1562_v46 = vadd.f32 %v4200_v10, %v4188_v0  ;;  %vm1590_vm0 = vcmp.ge.f32.partialorder %v1558_v51, 0.0  ;;  %v3514_v11 = vld [vmem:[#allocation7 + $0x190] ss:$8 sps:$4 sm:$0xff]   ;;  %v3517_v0 = vld [vmem:[#allocation7 + $0x1a0] ss:$8 sps:$4 sm:$0xff]  }
 0x27e   :  { %2147 = vmatprep.subr.bf16.mxu0 %v3510_v44  ;;  %v1655_v61 = vsel %vm1591_vm15, %v1559_v43, %v1623_v58  ;;  %v1622_v52 = vmul.f32 0.2, %v1558_v51  ;;  %v3522_v10 = vld [vmem:[#allocation7 + $0x1b4] ss:$8 sps:$4 sm:$0xff]   ;;  %v3531_v15 = vld [vmem:[#allocation7 + $0x1e4] ss:$8 sps:$4 sm:$0xff]  }
 0x27f   :  { %v1675_v38 = vpack.c.bf16 %v1659_v55, %v1655_v61  ;;  %vm1594_vm1 = vcmp.ge.f32.partialorder %v1562_v46, 0.0  ;;  %v1626_v18 = vmul.f32 0.2, %v1562_v46  ;;  %v3544_v4 = vld [vmem:[#allocation8 + $0x20] sm:$0xff]   ;;  %v3545_v30 = vld [vmem:[#allocation8 + $0x68] sm:$0xff]   ;;  %v3547_v32 = vld [vmem:[#allocation8 + $0x70] sm:$0xff]  }
 0x280   :  { %v1654_v63 = vsel %vm1590_vm0, %v1558_v51, %v1622_v52  ;;  %v3546_v8 = vld [vmem:[#allocation8 + $0x28] sm:$0xff]   ;;  %v3548_v31 = vld [vmem:[#allocation8 + $0x30] sm:$0xff]   ;;  %v3550_v33 = vld [vmem:[#allocation8 + $0x38] sm:$0xff]  }
 0x281   :  { %2148 = vmatpush1.bf16.msra.mxu0 %v3508_v28  ;;  %v1658_v60 = vsel %vm1594_vm1, %v1562_v46, %v1626_v18 }
 0x282   :  { %2149 = vmatprep.subr.bf16.mxu0 %v3513_v25  ;;  %v1674_v37 = vpack.c.bf16 %v1658_v60, %v1654_v63 }
 0x285   :  { %2150 = vmatpush1.bf16.msra.mxu0 %v3511_v53 }
 0x286   :  { %2151 = vmatprep.subr.bf16.mxu0 %v3516_v56 }
 0x289   :  { %2152 = vmatpush1.bf16.msra.mxu0 %v3514_v11 }
 0x28a   :  { %2153 = vmatprep.subr.bf16.mxu0 %v3519_v27 }
 0x28d   :  { %2154 = vmatpush1.bf16.msra.mxu0 %v3517_v0 }
 0x28e   :  { %2155 = vmatprep.subr.bf16.mxu0 %v3522_v10 }
 0x291   :  { %2156 = vmatpush1.bf16.msra.mxu0 %v3520_v22 }
 0x292   :  { %2157 = vmatprep.subr.bf16.mxu0 %v3525_v1 }
 0x295   :  { %2158 = vmatpush1.bf16.msra.mxu0 %v3523_v5 }
 0x296   :  { %2159 = vmatprep.subr.bf16.mxu0 %v3528_v50 }
 0x299   :  { %2160 = vmatpush1.bf16.msra.mxu0 %v3526_v39 }
 0x29a   :  { %2161 = vmatprep.subr.bf16.mxu0 %v3531_v15 }
 0x29d   :  { %2162 = vmatpush1.bf16.msra.mxu0 %v3529_v9 }
 0x29e   :  { %2163 = vmatprep.subr.bf16.mxu0 %v3534_v19 }
 0x2a1   :  { %2164 = vmatpush1.bf16.msra.mxu0 %v3532_v29 }
 0x2a2   :  { %3109 = vmatprep.subr.bf16.mxu0 %v3535_v3 }
 0x2a4   :  { %2166 = vmatmul.mubr.bf16.vlgmr.msra.gmra.mrb[16].mxu0 %v1662_v17  ;;  %v3541_v17 = vld [vmem:[#allocation8 + $0x58] sm:$0xff]  }
 0x2a5   :  { %2175 = vmatprep.mubr.bf16.mxu0 %v1667_v35  ;;  %3110 = vmatpush3.bf16.msra.mxu0 %v3536_v2  ;;  %v3549_v35 = vld [vmem:[#allocation8 + $0x78] sm:$0xff]  }
 0x2a6   :  { %3111 = vmatprep.subr.bf16.mxu0 %v3537_v20 }
 0x2a9   :  { %3112 = vmatpush3.bf16.msra.mxu0 %v3538_v13 }
 0x2aa   :  { %3113 = vmatprep.subr.bf16.mxu0 %v3539_v62 }
 0x2ac   :  { %2176 = vmatmul.mubr.bf16.gmra.mrb[20].mxu0 %v1666_v6 }
 0x2ad   :  { %2185 = vmatprep.mubr.bf16.mxu0 %v1671_v21  ;;  %3114 = vmatpush3.bf16.msra.mxu0 %v3540_v26 }
 0x2ae   :  { %3115 = vmatprep.subr.bf16.mxu0 %v3541_v17 }
 0x2b1   :  { %3116 = vmatpush3.bf16.msra.mxu0 %v3542_v7 }
 0x2b2   :  { %3117 = vmatprep.subr.bf16.mxu0 %v3543_v40 }
 0x2b4   :  { %2186 = vmatmul.mubr.bf16.gmra.mrb[24].mxu0 %v1670_v49 }
 0x2b5   :  { %2195 = vmatprep.mubr.bf16.mxu0 %v1675_v38  ;;  %3118 = vmatpush3.bf16.msra.mxu0 %v3544_v4 }
 0x2b6   :  { %3119 = vmatprep.subr.bf16.mxu0 %v3545_v30 }
 0x2b9   :  { %3120 = vmatpush3.bf16.msra.mxu0 %v3546_v8 }
 0x2ba   :  { %3121 = vmatprep.subr.bf16.mxu0 %v3547_v32 }
 0x2bc   :  { %2196 = vmatmul.mubr.bf16.gmra.mrb[28].mxu0 %v1674_v37 }
 0x2bd   :  { %3122 = vmatpush3.bf16.msra.mxu0 %v3548_v31 }
 0x2be   :  { %3123 = vmatprep.subr.bf16.mxu0 %v3549_v35 }
 0x2c1   :  { %3124 = vmatpush3.bf16.msra.mxu0 %v3550_v33 }
 0x377   :  { %v4309_v36 = vpop.f32.mrb[16].mxu0 }
 0x378   :  { %v4311_v16 = vpop.f32.mrb[17].mxu0  ;;  %v2238_v6 = vmul.f32 %v4309_v36, %v4309_v36 }
 0x379   :  { %v4313_v41 = vpop.f32.mrb[18].mxu0  ;;  %v2239_v44 = vmul.f32 %v4311_v16, %v4311_v16 }
 0x37a   :  { %v2210_v12 = vadd.f32 %v4313_v41, %v4309_v36  ;;  %v2240_v42 = vmul.f32 %v4313_v41, %v4313_v41  ;;  %v4321_v23 = vpop.f32.mrb[19].mxu0 }
 0x37b   :  { %v2223_v59 = vadd.f32 %v4321_v23, %v4311_v16  ;;  %v2241_v45 = vmul.f32 %v4321_v23, %v4321_v23 }
 0x37c   :  { %v2254_v43 = vadd.f32 %v2240_v42, %v2238_v6 }
 0x37d   :  { %v2267_v47 = vadd.f32 %v2241_v45, %v2239_v44 }
 0x37f   :  { %v4329_v48 = vpop.f32.mrb[20].mxu0 }
 0x380   :  { %v2211_v54 = vadd.f32 %v2210_v12, %v4329_v48  ;;  %v2242_v51 = vmul.f32 %v4329_v48, %v4329_v48  ;;  %v4334_v21 = vpop.f32.mrb[21].mxu0 }
 0x381   :  { %v2224_v57 = vadd.f32 %v2223_v59, %v4334_v21  ;;  %v2243_v58 = vmul.f32 %v4334_v21, %v4334_v21  ;;  %v4339_v28 = vpop.f32.mrb[22].mxu0 }
 0x382   :  { %v2255_v49 = vadd.f32 %v2254_v43, %v2242_v51  ;;  %v2212_v55 = vadd.f32 %v2211_v54, %v4339_v28  ;;  %v2244_v46 = vmul.f32 %v4339_v28, %v4339_v28  ;;  %v4344_v25 = vpop.f32.mrb[23].mxu0 }
 0x383   :  { %v2268_v61 = vadd.f32 %v2267_v47, %v2243_v58  ;;  %v2225_v52 = vadd.f32 %v2224_v57, %v4344_v25  ;;  %v2245_v38 = vmul.f32 %v4344_v25, %v4344_v25 }
 0x384   :  { %v2256_v18 = vadd.f32 %v2255_v49, %v2244_v46 }
 0x385   :  { %v2269_v63 = vadd.f32 %v2268_v61, %v2245_v38 }
 0x387   :  { %v4349_v53 = vpop.f32.mrb[24].mxu0 }
 0x388   :  { %v2213_v60 = vadd.f32 %v2212_v55, %v4349_v53  ;;  %v2246_v56 = vmul.f32 %v4349_v53, %v4349_v53  ;;  %v4354_v37 = vpop.f32.mrb[25].mxu0 }
 0x389   :  { %v2226_v11 = vadd.f32 %v2225_v52, %v4354_v37  ;;  %v2247_v27 = vmul.f32 %v4354_v37, %v4354_v37  ;;  %v4359_v0 = vpop.f32.mrb[26].mxu0 }
 0x38a   :  { %v2257_v10 = vadd.f32 %v2256_v18, %v2246_v56  ;;  %v2214_v22 = vadd.f32 %v2213_v60, %v4359_v0  ;;  %v2248_v1 = vmul.f32 %v4359_v0, %v4359_v0  ;;  %v4364_v5 = vpop.f32.mrb[27].mxu0 }
 0x38b   :  { %v2270_v50 = vadd.f32 %v2269_v63, %v2247_v27  ;;  %v2227_v39 = vadd.f32 %v2226_v11, %v4364_v5  ;;  %v2249_v15 = vmul.f32 %v4364_v5, %v4364_v5 }
 0x38c   :  { %v2258_v9 = vadd.f32 %v2257_v10, %v2248_v1 }
 0x38d   :  { %v2271_v19 = vadd.f32 %v2270_v50, %v2249_v15 }
 0x38f   :  { %v4369_v29 = vpop.f32.mrb[28].mxu0 }
 0x390   :  { %v2215_v3 = vadd.f32 %v2214_v22, %v4369_v29  ;;  %v2250_v2 = vmul.f32 %v4369_v29, %v4369_v29  ;;  %v4374_v20 = vpop.f32.mrb[29].mxu0 }
 0x391   :  { %v2228_v13 = vadd.f32 %v2227_v39, %v4374_v20  ;;  %v2251_v62 = vmul.f32 %v4374_v20, %v4374_v20  ;;  %v4379_v26 = vpop.f32.mrb[30].mxu0 }
 0x392   :  { %v2259_v17 = vadd.f32 %v2258_v9, %v2250_v2  ;;  %v2216_v7 = vadd.f32 %v2215_v3, %v4379_v26  ;;  %v2252_v40 = vmul.f32 %v4379_v26, %v4379_v26  ;;  %v2203_v4 = vpop.f32.mrb[31].mxu0 }
 0x393   :  { %v2272_v30 = vadd.f32 %v2271_v19, %v2251_v62  ;;  %v2229_v8 = vadd.f32 %v2228_v13, %v2203_v4  ;;  %v2253_v32 = vmul.f32 %v2203_v4, %v2203_v4 }
 0x394   :  { %v2217_v31 = vrot.slane %v2216_v7, 4  ;;  %v2260_v35 = vadd.f32 %v2259_v17, %v2252_v40 }
 0x395   :  { %v2230_v33 = vrot.slane %v2229_v8, 4  ;;  %v2273_v6 = vadd.f32 %v2272_v30, %v2253_v32  ;;  %v2207_v30 = vld [vmem:[#allocation11 + $0x2] ss:$8 sm:$0x3] }
 0x396   :  { %v2218_v12 = vadd.f32 %v2217_v31, %v2216_v7  ;;  %v2261_v42 = vrot.slane %v2260_v35, 4 }
 0x397   :  { %v2231_v44 = vadd.f32 %v2230_v33, %v2229_v8  ;;  %v2274_v59 = vrot.slane %v2273_v6, 4 }
 0x398   :  { %v2219_v45 = vrot.slane %v2218_v12, 2  ;;  %v2262_v43 = vadd.f32 %v2261_v42, %v2260_v35 }
 0x399   :  { %v2232_v47 = vrot.slane %v2231_v44, 2  ;;  %v2275_v54 = vadd.f32 %v2274_v59, %v2273_v6 }
 0x39a   :  { %v2220_v51 = vadd.f32 %v2219_v45, %v2218_v12  ;;  %v2263_v57 = vrot.slane %v2262_v43, 2 }
 0x39b   :  { %v2233_v58 = vadd.f32 %v2232_v47, %v2231_v44  ;;  %v2276_v49 = vrot.slane %v2275_v54, 2 }
 0x39c   :  { %v2221_v55 = vrot.slane %v2220_v51, 1  ;;  %v2264_v46 = vadd.f32 %v2263_v57, %v2262_v43 }
 0x39d   :  { %v2234_v61 = vrot.slane %v2233_v58, 1  ;;  %v2277_v52 = vadd.f32 %v2276_v49, %v2275_v54 }
 0x39e   :  { %v2222_v38 = vadd.f32 %v2221_v55, %v2220_v51  ;;  %v2265_v18 = vrot.slane %v2264_v46, 1 }
 0x39f   :  { %v2235_v63 = vadd.f32 %v2234_v61, %v2233_v58  ;;  %v2278_v60 = vrot.slane %v2277_v52, 1 }
 0x3a0   :  { %v2236_v56 = vmul.f32 0.015625, %v2222_v38  ;;  %v2266_v11 = vadd.f32 %v2265_v18, %v2264_v46 }
 0x3a1   :  { %v2237_v27 = vmul.f32 0.015625, %v2235_v63  ;;  %v2279_v10 = vadd.f32 %v2278_v60, %v2277_v52 }
 0x3a2   :  { %v2280_v22 = vmul.f32 0.015625, %v2266_v11  ;;  %v2282_v1 = vmul.f32 %v2236_v56, %v2236_v56 }
 0x3a3   :  { %v2281_v50 = vmul.f32 0.015625, %v2279_v10  ;;  %v2283_v39 = vmul.f32 %v2237_v27, %v2237_v27 }
 0x3a4   :  { %v2284_v15 = vsub.f32 %v2280_v22, %v2282_v1 }
 0x3a5   :  { %v2285_v9 = vsub.f32 %v2281_v50, %v2283_v39 }
 0x3a6   :  { %v2286_v19 = vmax.f32 %v2284_v15, 0.0 }
 0x3a7   :  { %v2287_v3 = vmax.f32 %v2285_v9, 0.0 }
 0x3a8   :  { %v2288_v2 = vadd.f32 1e-05, %v2286_v19 }
 0x3a9   :  { %v2289_v13 = vadd.f32 1e-05, %v2287_v3 }
 0x3aa   :  { %3567 = vrsqrt.f32 %v2288_v2 }
 0x3ab   :  { %3569 = vrsqrt.f32 %v2289_v13 }
 0x3b4   :  { %v3568_v62 = vpop.eup %3567 }
 0x3b5   :  { %v3570_v17 = vpop.eup %3569 }
 0x3b6   :  { %v2294_v7 = vcombine.low %v3568_v62, %v3570_v17 }
 0x3b8   :  { %v2301_v40 = vrot.slane %v2294_v7, %v4116_v34 }
 0x3ba   :  { %v2308_v8 = vrot.slane %v2301_v40, %v4116_v34 }
 0x3bc   :  { %v2310_v32 = vmul.f32 %v2308_v8, %v2207_v30 }
 0x3be   :  { %v2315_v31 = vrot.slane %v2310_v32, %v4121_v14  ;;  %v2319_v35 = vrot.slane %v2310_v32, %v4125_v24 }
 0x3c0   :  { %v2322_v33 = vmul.f32 %v2315_v31, %v2236_v56  ;;  %v2323_v6 = vmul.f32 %v2319_v35, %v2237_v27  ;;  %v2358_v12 = vmul.f32 %v2319_v35, %v2203_v4  ;;  %v2344_v42 = vmul.f32 %v2319_v35, %v4311_v16 }
 0x3c1   :  { %v2346_v44 = vmul.f32 %v2319_v35, %v4321_v23  ;;  %v2343_v59 = vmul.f32 %v2315_v31, %v4309_v36  ;;  %v2345_v45 = vmul.f32 %v2315_v31, %v4313_v41  ;;  %v2348_v43 = vmul.f32 %v2319_v35, %v4334_v21 }
 0x3c2   :  { %v2326_v47 = vcombine.low %v2322_v33, %v2323_v6  ;;  %v2350_v54 = vmul.f32 %v2319_v35, %v4344_v25  ;;  %v2347_v51 = vmul.f32 %v2315_v31, %v4329_v48  ;;  %v2349_v57 = vmul.f32 %v2315_v31, %v4339_v28  ;;  %v2209_v48 = vld [vmem:[#allocation11 + $0x3] ss:$8 sm:$0x3] }
 0x3c3   :  { %v2352_v58 = vmul.f32 %v2319_v35, %v4354_v37  ;;  %v2354_v4 = vmul.f32 %v2319_v35, %v4364_v5  ;;  %v2351_v16 = vmul.f32 %v2315_v31, %v4349_v53  ;;  %v2353_v23 = vmul.f32 %v2315_v31, %v4359_v0 }
 0x3c4   :  { %v2333_v36 = vrot.slane %v2326_v47, %v4116_v34  ;;  %v2356_v41 = vmul.f32 %v2319_v35, %v4374_v20  ;;  %v4403_v21 = vmul.f32 %v2315_v31, %v4369_v29  ;;  %v4406_v25 = vmul.f32 %v2315_v31, %v4379_v26 }
 0x3c6   :  { %v2340_v28 = vrot.slane %v2333_v36, %v4116_v34 }
 0x3c8   :  { %v2342_v37 = vsub.f32 %v2209_v48, %v2340_v28  ;;  %v3554_v48 = vld [vmem:[#allocation10 + $0x18] sm:$0xff]   ;;  %v3555_v28 = vld [vmem:[#allocation10 + $0x20] sm:$0xff]  }
 0x3ca   :  { %v4410_v5 = vrot.slane %v2342_v37, %v4121_v14  ;;  %v2367_v53 = vrot.slane %v2342_v37, %v4125_v24  ;;  %v3556_v37 = vld [vmem:[#allocation10 + $0x28] sm:$0xff]  }
 0x3cc   :  { %v4413_v0 = vadd.f32 %v2367_v53, %v2358_v12  ;;  %v2371_v49 = vadd.f32 %v2367_v53, %v2344_v42  ;;  %v2373_v55 = vadd.f32 %v2367_v53, %v2346_v44  ;;  %v2370_v20 = vadd.f32 %v4410_v5, %v2343_v59 }
 0x3cd   :  { %v2372_v29 = vadd.f32 %v4410_v5, %v2345_v45  ;;  %v2375_v46 = vadd.f32 %v2367_v53, %v2348_v43  ;;  %v2377_v26 = vadd.f32 %v2367_v53, %v2350_v54  ;;  %v2374_v61 = vadd.f32 %v4410_v5, %v2347_v51 }
 0x3ce   :  { %vm2387_vm2 = vcmp.ge.f32.partialorder %v2371_v49, 0.0  ;;  %vm2389_vm3 = vcmp.ge.f32.partialorder %v2373_v55, 0.0  ;;  %v2403_v34 = vmul.f32 0.2, %v2371_v49  ;;  %v2405_v52 = vmul.f32 0.2, %v2373_v55 }
 0x3cf   :  { %vm2386_vm4 = vcmp.ge.f32.partialorder %v2370_v20, 0.0  ;;  %vm2388_vm5 = vcmp.ge.f32.partialorder %v2372_v29, 0.0  ;;  %v2402_v14 = vmul.f32 0.2, %v2370_v20  ;;  %v2404_v24 = vmul.f32 0.2, %v2372_v29 }
 0x3d0   :  { %v2419_v38 = vsel %vm2387_vm2, %v2371_v49, %v2403_v34  ;;  %v2421_v18 = vsel %vm2389_vm3, %v2373_v55, %v2405_v52  ;;  %vm2391_vm6 = vcmp.ge.f32.partialorder %v2375_v46, 0.0  ;;  %vm2393_vm7 = vcmp.ge.f32.partialorder %v2377_v26, 0.0 }
 0x3d1   :  { %v2435_v63 = vpack.c.bf16 %v2421_v18, %v2419_v38  ;;  %v2418_v60 = vsel %vm2386_vm4, %v2370_v20, %v2402_v14  ;;  %v2420_v56 = vsel %vm2388_vm5, %v2372_v29, %v2404_v24  ;;  %v2407_v11 = vmul.f32 0.2, %v2375_v46 }
 0x3d2   :  { %v2434_v27 = vpack.c.bf16 %v2420_v56, %v2418_v60  ;;  %v2409_v10 = vmul.f32 0.2, %v2377_v26  ;;  %v2376_v22 = vadd.f32 %v4410_v5, %v2349_v57  ;;  %vm2390_vm8 = vcmp.ge.f32.partialorder %v2374_v61, 0.0 }
 0x3d3   :  { %2602 = vmatprep.mubr.bf16.mxu0 %v2435_v63  ;;  %v2423_v1 = vsel %vm2391_vm6, %v2375_v46, %v2407_v11  ;;  %v2406_v50 = vmul.f32 0.2, %v2374_v61  ;;  %v2379_v39 = vadd.f32 %v2367_v53, %v2352_v58  ;;  %v2381_v15 = vadd.f32 %v2367_v53, %v2354_v4 }
 0x3d4   :  { %2603 = vmatmul.mubr.bf16.vlgmr.msra.gmra.mrb[32].mxu0 %v2434_v27  ;;  %v2425_v9 = vsel %vm2393_vm7, %v2377_v26, %v2409_v10  ;;  %vm2392_vm9 = vcmp.ge.f32.partialorder %v2376_v22, 0.0  ;;  %v2408_v19 = vmul.f32 0.2, %v2376_v22  ;;  %v2378_v3 = vadd.f32 %v4410_v5, %v2351_v16 }
 0x3d5   :  { %v2437_v2 = vpack.c.bf16 %v2425_v9, %v2423_v1  ;;  %v2422_v13 = vsel %vm2390_vm8, %v2374_v61, %v2406_v50  ;;  %vm2395_vm10 = vcmp.ge.f32.partialorder %v2379_v39, 0.0  ;;  %vm2397_vm11 = vcmp.ge.f32.partialorder %v2381_v15, 0.0 }
 0x3d6   :  { %v2424_v62 = vsel %vm2392_vm9, %v2376_v22, %v2408_v19  ;;  %v2411_v17 = vmul.f32 0.2, %v2379_v39  ;;  %v2413_v7 = vmul.f32 0.2, %v2381_v15  ;;  %v2380_v40 = vadd.f32 %v4410_v5, %v2353_v23 }
 0x3d7   :  { %2610 = vmatprep.mubr.bf16.mxu0 %v2437_v2  ;;  %v2436_v30 = vpack.c.bf16 %v2424_v62, %v2422_v13  ;;  %vm2394_vm12 = vcmp.ge.f32.partialorder %v2378_v3, 0.0  ;;  %v2410_v8 = vmul.f32 0.2, %v2378_v3  ;;  %v2383_v32 = vadd.f32 %v2367_v53, %v2356_v41  ;;  %v3551_v41 = vld [vmem:[#allocation10] sm:$0xff]   ;;  %v3558_v53 = vld [vmem:[#allocation10 + $0x38] sm:$0xff]  }
 0x3d8   :  { %v2427_v31 = vsel %vm2395_vm10, %v2379_v39, %v2411_v17  ;;  %v2429_v35 = vsel %vm2397_vm11, %v2381_v15, %v2413_v7  ;;  %vm2396_vm13 = vcmp.ge.f32.partialorder %v2380_v40, 0.0  ;;  %v2412_v33 = vmul.f32 0.2, %v2380_v40  ;;  %3161 = vmatprep.subr.bf16.mxu1 %v3551_v41 }
 0x3d9   :  { %v2439_v6 = vpack.c.bf16 %v2429_v35, %v2427_v31  ;;  %v2426_v12 = vsel %vm2394_vm12, %v2378_v3, %v2410_v8  ;;  %vm2399_vm14 = vcmp.ge.f32.partialorder %v2383_v32, 0.0  ;;  %vm2401_vm15 = vcmp.ge.f32.partialorder %v4413_v0, 0.0  ;;  %3162 = vmatpush3.bf16.msra.mxu1 %v3551_v41 }
 0x3da   :  { %v2428_v42 = vsel %vm2396_vm13, %v2380_v40, %v2412_v33  ;;  %v2415_v44 = vmul.f32 0.2, %v2383_v32  ;;  %v2417_v59 = vmul.f32 0.2, %v4413_v0  ;;  %v2382_v45 = vadd.f32 %v4410_v5, %v4403_v21  ;;  %v3552_v21 = vld [vmem:[#allocation10 + $0x8] sm:$0xff]  }
 0x3db   :  { %v2438_v43 = vpack.c.bf16 %v2428_v42, %v2426_v12  ;;  %v2384_v47 = vadd.f32 %v4410_v5, %v4406_v25  ;;  %3163 = vmatprep.subr.bf16.mxu1 %v3552_v21  ;;  %v3553_v25 = vld [vmem:[#allocation10 + $0x10] sm:$0xff]  }
 0x3dc   :  { %2611 = vmatmul.mubr.bf16.gmra.mrb[36].mxu0 %v2436_v30  ;;  %v2431_v54 = vsel %vm2399_vm14, %v2383_v32, %v2415_v44  ;;  %v2433_v51 = vsel %vm2401_vm15, %v4413_v0, %v2417_v59  ;;  %vm2398_vm0 = vcmp.ge.f32.partialorder %v2382_v45, 0.0  ;;  %v2414_v57 = vmul.f32 0.2, %v2382_v45  ;;  %v3557_v5 = vld [vmem:[#allocation10 + $0x30] sm:$0xff]  }
 0x3dd   :  { %2618 = vmatprep.mubr.bf16.mxu0 %v2439_v6  ;;  %v2441_v58 = vpack.c.bf16 %v2433_v51, %v2431_v54  ;;  %vm2400_vm1 = vcmp.ge.f32.partialorder %v2384_v47, 0.0  ;;  %v2416_v4 = vmul.f32 0.2, %v2384_v47  ;;  %3164 = vmatpush3.bf16.msra.mxu1 %v3552_v21 }
 0x3de   :  { %v2430_v16 = vsel %vm2398_vm0, %v2382_v45, %v2414_v57  ;;  %3165 = vmatprep.subr.bf16.mxu1 %v3553_v25 }
 0x3df   :  { %v2432_v23 = vsel %vm2400_vm1, %v2384_v47, %v2416_v4 }
 0x3e0   :  { %v2440_v36 = vpack.c.bf16 %v2432_v23, %v2430_v16 }
 0x3e1   :  { %3166 = vmatpush3.bf16.msra.mxu1 %v3553_v25 }
 0x3e2   :  { %3167 = vmatprep.subr.bf16.mxu1 %v3554_v48 }
 0x3e4   :  { %2619 = vmatmul.mubr.bf16.gmra.mrb[40].mxu0 %v2438_v43 }
 0x3e5   :  { %2626 = vmatprep.mubr.bf16.mxu0 %v2441_v58  ;;  %3168 = vmatpush3.bf16.msra.mxu1 %v3554_v48 }
 0x3e6   :  { %3169 = vmatprep.subr.bf16.mxu1 %v3555_v28 }
 0x3e9   :  { %3170 = vmatpush3.bf16.msra.mxu1 %v3555_v28 }
 0x3ea   :  { %3171 = vmatprep.subr.bf16.mxu1 %v3556_v37 }
 0x3ec   :  { %2627 = vmatmul.mubr.bf16.gmra.mrb[44].mxu0 %v2440_v36 }
 0x3ed   :  { %3172 = vmatpush3.bf16.msra.mxu1 %v3556_v37 }
 0x3ee   :  { %3173 = vmatprep.subr.bf16.mxu1 %v3557_v5 }
 0x3f1   :  { %3174 = vmatpush3.bf16.msra.mxu1 %v3557_v5 }
 0x3f2   :  { %3175 = vmatprep.subr.bf16.mxu1 %v3558_v53 }
 0x3f5   :  { %3176 = vmatpush3.bf16.msra.mxu1 %v3558_v53 }
 0x4a7   :  { %v3125_v0 = vpop.f32.mrb[32].mxu0 }
 0x4a8   :  { %v3126_v49 = vpop.f32.mrb[33].mxu0 }
 0x4a9   :  { %v4428_v55 = vadd.f32 %v3126_v49, %v3125_v0  ;;  %v3128_v20 = vpop.f32.mrb[34].mxu0  ;;  %v2635_v0 = vld [vmem:[#allocation11 + $0x4] ss:$0 sm:$0xff] }
 0x4aa   :  { %v3129_v29 = vpop.f32.mrb[35].mxu0 }
 0x4ab   :  { %v4430_v46 = vadd.f32 %v3129_v29, %v3128_v20  ;;  %v2651_v26 = vmul.f32 %v4428_v55, %v4428_v55  ;;  %v2636_v29 = vld [vmem:[#allocation11 + $0x5] ss:$0 sm:$0xff] }
 0x4ad   :  { %v2637_v61 = vadd.f32 %v4430_v46, %v4428_v55  ;;  %v2652_v34 = vmul.f32 %v4430_v46, %v4430_v46 }
 0x4af   :  { %v2659_v52 = vadd.f32 %v2652_v34, %v2651_v26  ;;  %v3131_v14 = vpop.f32.mrb[36].mxu0 }
 0x4b0   :  { %v3132_v24 = vpop.f32.mrb[37].mxu0 }
 0x4b1   :  { %v3133_v38 = vadd.f32 %v3132_v24, %v3131_v14  ;;  %v3134_v18 = vpop.f32.mrb[38].mxu0 }
 0x4b2   :  { %v3135_v63 = vpop.f32.mrb[39].mxu0 }
 0x4b3   :  { %v2638_v60 = vadd.f32 %v3133_v38, %v2637_v61  ;;  %v2653_v56 = vmul.f32 %v3133_v38, %v3133_v38  ;;  %v3136_v11 = vadd.f32 %v3135_v63, %v3134_v18 }
 0x4b5   :  { %v2660_v27 = vadd.f32 %v2659_v52, %v2653_v56  ;;  %v2639_v10 = vadd.f32 %v3136_v11, %v2638_v60  ;;  %v2654_v22 = vmul.f32 %v3136_v11, %v3136_v11 }
 0x4b7   :  { %v2661_v1 = vadd.f32 %v2660_v27, %v2654_v22  ;;  %v3137_v50 = vpop.f32.mrb[40].mxu0 }
 0x4b8   :  { %v3138_v39 = vpop.f32.mrb[41].mxu0 }
 0x4b9   :  { %v3139_v15 = vadd.f32 %v3138_v39, %v3137_v50  ;;  %v3140_v9 = vpop.f32.mrb[42].mxu0 }
 0x4ba   :  { %v3141_v19 = vpop.f32.mrb[43].mxu0 }
 0x4bb   :  { %v2640_v3 = vadd.f32 %v3139_v15, %v2639_v10  ;;  %v2655_v2 = vmul.f32 %v3139_v15, %v3139_v15  ;;  %v3142_v13 = vadd.f32 %v3141_v19, %v3140_v9 }
 0x4bd   :  { %v2662_v62 = vadd.f32 %v2661_v1, %v2655_v2  ;;  %v2641_v17 = vadd.f32 %v3142_v13, %v2640_v3  ;;  %v2656_v7 = vmul.f32 %v3142_v13, %v3142_v13 }
 0x4bf   :  { %v2663_v40 = vadd.f32 %v2662_v62, %v2656_v7  ;;  %v3143_v30 = vpop.f32.mrb[44].mxu0 }
 0x4c0   :  { %v3144_v8 = vpop.f32.mrb[45].mxu0 }
 0x4c1   :  { %v3145_v32 = vadd.f32 %v3144_v8, %v3143_v30  ;;  %v3146_v31 = vpop.f32.mrb[46].mxu0 }
 0x4c2   :  { %v3147_v35 = vpop.f32.mrb[47].mxu0 }
 0x4c3   :  { %v2642_v33 = vadd.f32 %v3145_v32, %v2641_v17  ;;  %v2657_v6 = vmul.f32 %v3145_v32, %v3145_v32  ;;  %v3148_v12 = vadd.f32 %v3147_v35, %v3146_v31 }
 0x4c5   :  { %v2664_v42 = vadd.f32 %v2663_v40, %v2657_v6  ;;  %v2643_v44 = vadd.f32 %v3148_v12, %v2642_v33  ;;  %v2658_v59 = vmul.f32 %v3148_v12, %v3148_v12 }
 0x4c7   :  { %v2644_v45 = vrot.slane %v2643_v44, 4  ;;  %v2665_v43 = vadd.f32 %v2664_v42, %v2658_v59  ;;  %v2741_v42 = vld [vmem:[#allocation11 + $0x6] ss:$0 sm:$0xff] }
 0x4c9   :  { %v2645_v47 = vadd.f32 %v2644_v45, %v2643_v44  ;;  %v2666_v54 = vrot.slane %v2665_v43, 4 }
 0x4cb   :  { %v2646_v51 = vrot.slane %v2645_v47, 2  ;;  %v2667_v57 = vadd.f32 %v2666_v54, %v2665_v43 }
 0x4cd   :  { %v2647_v58 = vadd.f32 %v2646_v51, %v2645_v47  ;;  %v2668_v4 = vrot.slane %v2667_v57, 2 }
 0x4cf   :  { %v2648_v16 = vrot.slane %v2647_v58, 1  ;;  %v2669_v23 = vadd.f32 %v2668_v4, %v2667_v57 }
 0x4d1   :  { %v2649_v36 = vadd.f32 %v2648_v16, %v2647_v58  ;;  %v2670_v41 = vrot.slane %v2669_v23, 1 }
 0x4d3   :  { %v2650_v21 = vmul.f32 0.015625, %v2649_v36  ;;  %v2671_v25 = vadd.f32 %v2670_v41, %v2669_v23 }
 0x4d5   :  { %v2672_v48 = vmul.f32 0.015625, %v2671_v25  ;;  %v2673_v28 = vmul.f32 %v2650_v21, %v2650_v21 }
 0x4d7   :  { %v2674_v37 = vsub.f32 %v2672_v48, %v2673_v28 }
 0x4d9   :  { %v2675_v5 = vmax.f32 %v2674_v37, 0.0 }
 0x4db   :  { %v2676_v53 = vadd.f32 1e-05, %v2675_v5 }
 0x4dd   :  { %3571 = vrsqrt.f32 %v2676_v53 }
 0x4e7   :  { %v3572_v49 = vpop.eup %3571 }
 0x4e8   :  { %v2678_v20 = vmul.f32 %v3572_v49, %v2635_v0 }
 0x4ea   :  { %v2679_v26 = vmul.f32 %v2678_v20, %v2650_v21  ;;  %v2688_v61 = vmul.f32 %v3148_v12, %v2678_v20  ;;  %v2681_v34 = vmul.f32 %v4428_v55, %v2678_v20  ;;  %v2682_v52 = vmul.f32 %v4430_v46, %v2678_v20 }
 0x4eb   :  { %v2683_v14 = vmul.f32 %v3133_v38, %v2678_v20  ;;  %v2684_v24 = vmul.f32 %v3136_v11, %v2678_v20  ;;  %v2685_v18 = vmul.f32 %v3139_v15, %v2678_v20  ;;  %v2686_v63 = vmul.f32 %v3142_v13, %v2678_v20 }
 0x4ec   :  { %v2680_v60 = vsub.f32 %v2636_v29, %v2679_v26  ;;  %v2687_v56 = vmul.f32 %v3145_v32, %v2678_v20 }
 0x4ee   :  { %v2696_v27 = vadd.f32 %v2688_v61, %v2680_v60  ;;  %v2689_v10 = vadd.f32 %v2681_v34, %v2680_v60  ;;  %v2690_v22 = vadd.f32 %v2682_v52, %v2680_v60  ;;  %v2691_v1 = vadd.f32 %v2683_v14, %v2680_v60 }
 0x4ef   :  { %v2692_v50 = vadd.f32 %v2684_v24, %v2680_v60  ;;  %v2693_v39 = vadd.f32 %v2685_v18, %v2680_v60  ;;  %v2694_v9 = vadd.f32 %v2686_v63, %v2680_v60  ;;  %v2695_v19 = vadd.f32 %v2687_v56, %v2680_v60 }
 0x4f0   :  { %vm2697_vm2 = vcmp.ge.f32.partialorder %v2689_v10, 0.0  ;;  %vm2698_vm3 = vcmp.ge.f32.partialorder %v2690_v22, 0.0  ;;  %v2705_v3 = vmul.f32 0.2, %v2689_v10  ;;  %v2706_v55 = vmul.f32 0.2, %v2690_v22 }
 0x4f1   :  { %vm2699_vm4 = vcmp.ge.f32.partialorder %v2691_v1, 0.0  ;;  %vm2700_vm5 = vcmp.ge.f32.partialorder %v2692_v50, 0.0  ;;  %v2707_v46 = vmul.f32 0.2, %v2691_v1  ;;  %v2708_v38 = vmul.f32 0.2, %v2692_v50 }
 0x4f2   :  { %v2713_v11 = vsel %vm2697_vm2, %v2689_v10, %v2705_v3  ;;  %v2714_v15 = vsel %vm2698_vm3, %v2690_v22, %v2706_v55  ;;  %vm2701_vm6 = vcmp.ge.f32.partialorder %v2693_v39, 0.0  ;;  %vm2702_vm7 = vcmp.ge.f32.partialorder %v2694_v9, 0.0 }
 0x4f3   :  { %v2721_v2 = vpack.c.bf16 %v2714_v15, %v2713_v11  ;;  %v2715_v13 = vsel %vm2699_vm4, %v2691_v1, %v2707_v46  ;;  %v2716_v62 = vsel %vm2700_vm5, %v2692_v50, %v2708_v38  ;;  %v2709_v17 = vmul.f32 0.2, %v2693_v39 }
 0x4f4   :  { %v2722_v7 = vpack.c.bf16 %v2716_v62, %v2715_v13  ;;  %v2710_v40 = vmul.f32 0.2, %v2694_v9  ;;  %vm2703_vm8 = vcmp.ge.f32.partialorder %v2695_v19, 0.0  ;;  %vm2704_vm9 = vcmp.ge.f32.partialorder %v2696_v27, 0.0 }
 0x4f5   :  { %3177 = vmatprep.mubr.bf16.mxu1 %v2721_v2  ;;  %v2717_v30 = vsel %vm2701_vm6, %v2693_v39, %v2709_v17  ;;  %v2711_v8 = vmul.f32 0.2, %v2695_v19  ;;  %v2712_v32 = vmul.f32 0.2, %v2696_v27 }
 0x4f6   :  { %3178 = vmatmul.mubr.bf16.vlgmr.msra.gmra.mrb[32].mxu1 %v2722_v7  ;;  %v2718_v31 = vsel %vm2702_vm7, %v2694_v9, %v2710_v40 }
 0x4f7   :  { %v2723_v35 = vpack.c.bf16 %v2718_v31, %v2717_v30  ;;  %v2719_v33 = vsel %vm2703_vm8, %v2695_v19, %v2711_v8  ;;  %v2720_v6 = vsel %vm2704_vm9, %v2696_v27, %v2712_v32 }
 0x4f8   :  { %v2724_v12 = vpack.c.bf16 %v2720_v6, %v2719_v33 }
 0x4f9   :  { %3181 = vmatprep.mubr.bf16.mxu1 %v2723_v35 }
 0x4fe   :  { %3182 = vmatmul.mubr.bf16.gmra.mrb[36].mxu1 %v2724_v12 }
 0x5c9   :  { %v3179_v44 = vpop.f32.mrb[32].mxu1 }
 0x5ca   :  { %v2833_v59 = vadd.f32 %v3179_v44, %v2741_v42  ;;  %v2824_v45 = vpop.f32.mrb[33].mxu1 }
 0x5cb   :  { %v2825_v43 = vadd.f32 %v2824_v45, %v2741_v42  ;;  %v3180_v47 = vpop.f32.mrb[34].mxu1 }
 0x5cc   :  { %2857 = vst [vmem:[#allocation13 + $0x10] sm:$0xff] %v2833_v59  ;;  %v2836_v54 = vadd.f32 %v3180_v47, %v2741_v42  ;;  %v2827_v51 = vpop.f32.mrb[35].mxu1 }
 0x5cd   :  { %2855 = vst [vmem:[#allocation13] sm:$0xff] %v2825_v43  ;;  %v2828_v57 = vadd.f32 %v2827_v51, %v2741_v42 }
 0x5ce   :  { %2858 = vst [vmem:[#allocation13 + $0x18] sm:$0xff] %v2836_v54 }
 0x5cf   :  { %2856 = vst [vmem:[#allocation13 + $0x8] sm:$0xff] %v2828_v57 }
 0x5d1   :  { %v3183_v58 = vpop.f32.mrb[36].mxu1 }
 0x5d2   :  { %v2849_v4 = vadd.f32 %v3183_v58, %v2741_v42  ;;  %v2840_v16 = vpop.f32.mrb[37].mxu1 }
 0x5d3   :  { %v2841_v23 = vadd.f32 %v2840_v16, %v2741_v42  ;;  %v3184_v36 = vpop.f32.mrb[38].mxu1 }
 0x5d4   :  { %2861 = vst [vmem:[#allocation13 + $0x30] sm:$0xff] %v2849_v4  ;;  %v2852_v41 = vadd.f32 %v3184_v36, %v2741_v42  ;;  %v2843_v21 = vpop.f32.mrb[39].mxu1 }
 0x5d5   :  { %2859 = vst [vmem:[#allocation13 + $0x20] sm:$0xff] %v2841_v23  ;;  %v2844_v25 = vadd.f32 %v2843_v21, %v2741_v42 }
 0x5d6   :  { %2862 = vst [vmem:[#allocation13 + $0x38] sm:$0xff] %v2852_v41 }
 0x5d7   :  { %2860 = vst [vmem:[#allocation13 + $0x28] sm:$0xff] %v2844_v25 }
 0x5d8   :  { %3716 = shalt.err (!%p3713_p10)
}
 0x5d9   :  { %s3717_s28 = scalar_lea.hbm %s4461_s6, 1024 }
 0x5da   :  { %p3718_p11 = scmp.ne.s32.totalorder %s4461_s6, %s3717_s28  ;;  %p3721_p12 = scmp.lt.u32.totalorder %s3717_s28, %s4461_s6 }
 0x5dc   :  { %p3723_p13 = pnand %p3721_p12, %p3718_p11 }
 0x5de   :  { %3726 = shalt.err (!%p3723_p13)
}
 0x5df   :  { %2874 = dma.vmem_to_hbm [thread:$0]  %s2869_s21, 1024, %s4461_s6, [#allocation4], %s3747_s0, %s3747_s0, %s3748_s24  }
 0x5e0   :  { %3735 = dma.done.wait [#allocation4], 1024  }
 0x5e1   :  { %3736 = vsyncadd [#allocation4], 4294966272 }
 0x5e2   :  { %2878 = vsyncpa [#allocation3], 1 }
 0x5e3   :  { %2879 = vsyncpa [#allocation6], 1 }
 0x5e4   :  { %2880 = vsyncpa [#allocation9], 1 }
 0x5e5   :  { %2881 = vsyncpa [#allocation12], 1 }
 0x5e6   :  { %2882 = vsyncpa [#allocation4], 1 }

</bundles_post_ra>
